<compile_context>
chip_gen: v6e
topology: v6e:2x2x1
jax: 0.10.0
libtpu: 0.0.40
codegen_flags: <defaults>
</compile_context>

<pallas_src>
import functools

import jax
import jax.numpy as jnp
from jax.experimental import pallas as pl
from jax.experimental.pallas import tpu as pltpu


# ----------------------------- Fused kernel -----------------------------
def _fused_lstm_classifier_kernel(*refs, num_layers, seq_len, batch, hidden_dim):
    """Fused multi-layer LSTM + MLP classifier, single gridless invocation.

    Ref order (inputs, output):
      refs[0]                              x_flat (S*B, D) bf16, time-major
      refs[1+3l], refs[2+3l], refs[3+3l]   per layer l:
                                           W_ih^T (Din,4H) bf16, W_hh^T (H,4H) bf16,
                                           bias (1,4H) f32 (= b_ih + b_hh)
      refs[1+3L .. 4+3L]                   W1^T (H,C), b1 (1,C), W2^T (C,O), b2 (1,O)
      refs[5+3L]                           out (B, O) f32
    """
    S, B, H, L = seq_len, batch, hidden_dim, num_layers

    x_ref = refs[0]
    layer_refs = [refs[1 + 3 * l: 4 + 3 * l] for l in range(L)]
    w1_ref, b1_ref, w2_ref, b2_ref = refs[1 + 3 * L: 5 + 3 * L]
    out_ref = refs[5 + 3 * L]

    # Hoist the small weights into vregs once.  NOTE: at H=32 whh/wih are 1-2
    # bf16 vregs per layer; for H >= 128 this would consume the whole register
    # file and spill — gate the hoist (read from the VMEM ref inside the loop)
    # if this kernel is reused at large hidden sizes.
    wih = [layer_refs[l][0][...] for l in range(L)]    # (Din, 4H) bf16
    whh = [layer_refs[l][1][...] for l in range(L)]    # (H,   4H) bf16
    bias = [layer_refs[l][2][...] for l in range(L)]   # (1,   4H) f32

    # Hoisted layer-0 non-recurrent projection for ALL time steps: one dense
    # MXU matmul; result ((S*B, 4H) f32, 2 vregs here) stays in registers.
    gx0 = jnp.dot(x_ref[...], wih[0], preferred_element_type=jnp.float32) + bias[0]

    def lstm_cell(gates, c_prev):
        # tanh-only nonlinearities: sigmoid(x) = 0.5*(tanh(0.5x)+1).  Full-width
        # (B,4H) EUP pushes, then cheap static slices; extra scale/shift is VPU.
        sig = 0.5 * (jnp.tanh(0.5 * gates) + 1.0)
        th = jnp.tanh(gates)
        i_g = sig[:, 0 * H:1 * H]
        f_g = sig[:, 1 * H:2 * H]
        g_g = th[:, 2 * H:3 * H]
        o_g = sig[:, 3 * H:4 * H]
        c_new = f_g * c_prev + i_g * g_g
        h_new = o_g * jnp.tanh(c_new)
        return h_new, c_new

    zeros = jnp.zeros((B, H), jnp.float32)
    h = [zeros for _ in range(L)]
    c = [zeros for _ in range(L)]

    # Fully unrolled wavefront recurrence (S=8, L=2 -> 16 inlined cells).
    # Layer l at time t consumes layer l-1's output at time t immediately, so
    # the dependent chain is ~S+L-1 steps and independent-layer matmuls can
    # overlap in the MXU.
    for t in range(S):
        for l in range(L):
            rec = jnp.dot(h[l].astype(jnp.bfloat16), whh[l],
                          preferred_element_type=jnp.float32)
            if l == 0:
                gates = gx0[t * B:(t + 1) * B, :] + rec
            else:
                gates = (jnp.dot(h[l - 1].astype(jnp.bfloat16), wih[l],
                                 preferred_element_type=jnp.float32)
                         + bias[l] + rec)
            h[l], c[l] = lstm_cell(gates, c[l])

    # Classifier on the top layer's last hidden state:
    # Linear -> ReLU -> Dropout(identity in eval) -> Linear.
    # TODO(synk): training-mode dropout (pltpu.prng_seed / prng_random_bits
    # masking) is not implemented; this kernel is inference-only.
    z = jnp.dot(h[L - 1], w1_ref[...], preferred_element_type=jnp.float32) + b1_ref[...]
    z = jnp.maximum(z, 0.0)
    out_ref[...] = (jnp.dot(z, w2_ref[...], preferred_element_type=jnp.float32)
                    + b2_ref[...])


# ----------------------------- Wrapper -----------------------------
def lstm_classifier_forward(x_bsd, params):
    """x_bsd: (batch, seq, input_dim) — PyTorch batch_first convention."""
    B, S, D = x_bsd.shape
    lstm_params = params["lstm"]
    L = len(lstm_params)
    H = lstm_params[0][1].shape[0]
    O = params["w2_t"].shape[1]

    # Time-major flattened (S*B, D) so the hoisted layer-0 projection is a
    # single lane/sublane-dense MXU matmul inside the kernel.
    x_flat = jnp.swapaxes(x_bsd, 0, 1).reshape(S * B, D).astype(jnp.bfloat16)

    args = [x_flat]
    for (wih_t, whh_t, bias) in lstm_params:
        args += [wih_t.astype(jnp.bfloat16), whh_t.astype(jnp.bfloat16), bias]
    args += [params["w1_t"], params["b1"], params["w2_t"], params["b2"]]

    kernel = functools.partial(
        _fused_lstm_classifier_kernel,
        num_layers=L, seq_len=S, batch=B, hidden_dim=H,
    )

    vmem = lambda: pl.BlockSpec(memory_space=pltpu.MemorySpace.VMEM)

    # Whole working set is ~100 KiB at these shapes -> gridless, everything
    # resident in VMEM, no scratch needed (all carries live in vregs).
    # TODO(synk): for production batch sizes, add a leading grid axis over
    # batch blocks with dimension_semantics=("parallel",) to use both v7x
    # TensorCores, and chunk the hoisted (S*B,4H) projection over a time
    # window if it approaches the VMEM limit.
    return pl.pallas_call(
        kernel,
        out_shape=jax.ShapeDtypeStruct((B, O), jnp.float32),
        in_specs=[vmem() for _ in args],
        out_specs=vmem(),
    )(*args)


# ----------------------------- Pure-JAX references -----------------------------
def _reference_forward(x_bsd, params, *, cast_bf16):
    """Reference LSTM+MLP.  cast_bf16=True mirrors the kernel's bf16 MXU operands."""
    cast = (lambda a: a.astype(jnp.bfloat16)) if cast_bf16 else (lambda a: a)
    B = x_bsd.shape[0]
    x = x_bsd
    for (wih_t, whh_t, bias) in params["lstm"]:
        H = whh_t.shape[0]
        wih_c, whh_c = cast(wih_t), cast(whh_t)

        def step(carry, x_t, wih_c=wih_c, whh_c=whh_c, bias=bias, H=H):
            h, c = carry
            gates = (jnp.dot(cast(x_t), wih_c, preferred_element_type=jnp.float32)
                     + jnp.dot(cast(h), whh_c, preferred_element_type=jnp.float32)
                     + bias[0])
            i = jax.nn.sigmoid(gates[:, 0 * H:1 * H])
            f = jax.nn.sigmoid(gates[:, 1 * H:2 * H])
            g = jnp.tanh(gates[:, 2 * H:3 * H])
            o = jax.nn.sigmoid(gates[:, 3 * H:4 * H])
            c = f * c + i * g
            h = o * jnp.tanh(c)
            return (h, c), h

        h0 = jnp.zeros((B, H), jnp.float32)
        (_, _), hs = jax.lax.scan(step, (h0, h0), jnp.swapaxes(x, 0, 1))
        x = jnp.swapaxes(hs, 0, 1)
    h_last = x[:, -1, :]
    z = jnp.maximum(h_last @ params["w1_t"] + params["b1"], 0.0)
    return z @ params["w2_t"] + params["b2"]


# ----------------------------- Deterministic parameter init -----------------------------
def init_params(key, input_dim, hidden_dim, layer_dim, classifier_dim, output_dim):
    params = {"lstm": []}
    k = 1.0 / jnp.sqrt(hidden_dim)
    for layer in range(layer_dim):
        d_in = input_dim if layer == 0 else hidden_dim
        key, k1, k2, k3, k4 = jax.random.split(key, 5)
        # PyTorch stores (4H, D); pre-transpose to (D, 4H) for y = x @ W^T.
        w_ih = jax.random.uniform(k1, (4 * hidden_dim, d_in), jnp.float32, -k, k)
        w_hh = jax.random.uniform(k2, (4 * hidden_dim, hidden_dim), jnp.float32, -k, k)
        b_ih = jax.random.uniform(k3, (4 * hidden_dim,), jnp.float32, -k, k)
        b_hh = jax.random.uniform(k4, (4 * hidden_dim,), jnp.float32, -k, k)
        params["lstm"].append(
            (w_ih.T, w_hh.T, (b_ih + b_hh).reshape(1, 4 * hidden_dim))
        )
    key, k1, k2, k3, k4 = jax.random.split(key, 5)
    k_lin1 = 1.0 / jnp.sqrt(hidden_dim)
    k_lin2 = 1.0 / jnp.sqrt(classifier_dim)
    w1 = jax.random.uniform(k1, (classifier_dim, hidden_dim), jnp.float32, -k_lin1, k_lin1)
    b1 = jax.random.uniform(k2, (classifier_dim,), jnp.float32, -k_lin1, k_lin1)
    w2 = jax.random.uniform(k3, (output_dim, classifier_dim), jnp.float32, -k_lin2, k_lin2)
    b2 = jax.random.uniform(k4, (output_dim,), jnp.float32, -k_lin2, k_lin2)
    params["w1_t"] = w1.T
    params["b1"] = b1.reshape(1, classifier_dim)
    params["w2_t"] = w2.T
    params["b2"] = b2.reshape(1, output_dim)
    return params


if __name__ == "__main__":
    # Small shapes consistent with the module's forward pass.
    batch, seq = 2, 8
    input_dim, hidden_dim, layer_dim = 16, 32, 2
    classifier_dim, output_dim = 64, 4

    key = jax.random.PRNGKey(0)
    key, xk = jax.random.split(key)
    x = jax.random.normal(xk, (batch, seq, input_dim), jnp.float32)

    params = init_params(key, input_dim, hidden_dim, layer_dim,
                         classifier_dim, output_dim)

    out = jax.jit(lstm_classifier_forward)(x, params)
    jax.block_until_ready(out)
    assert out.shape == (batch, output_dim)

    # Tight check vs a reference that uses the same bf16 MXU operands.
    ref_bf16 = _reference_forward(x, params, cast_bf16=True)
    assert jnp.allclose(out, ref_bf16, atol=2e-3, rtol=2e-3), "mismatch vs bf16 reference"

    # Looser check vs the pure-f32 reference: bounds the deliberate bf16-cast
    # error of the recurrent matmul operands (expected ~1e-3 here).
    ref_f32 = _reference_forward(x, params, cast_bf16=False)
    assert jnp.allclose(out, ref_f32, atol=1e-2, rtol=1e-2), "mismatch vs f32 reference"

    print("KERNEL_OK")
</pallas_src>

<mosaic_0001>
module attributes {stable_mosaic.version = 11 : i64} {
  func.func @_fused_lstm_classifier_kernel(%arg0: memref<16x16xbf16, #tpu.memory_space<vmem>>, %arg1: memref<16x128xbf16, #tpu.memory_space<vmem>>, %arg2: memref<32x128xbf16, #tpu.memory_space<vmem>>, %arg3: memref<1x128xf32, #tpu.memory_space<vmem>>, %arg4: memref<32x128xbf16, #tpu.memory_space<vmem>>, %arg5: memref<32x128xbf16, #tpu.memory_space<vmem>>, %arg6: memref<1x128xf32, #tpu.memory_space<vmem>>, %arg7: memref<32x64xf32, #tpu.memory_space<vmem>>, %arg8: memref<1x64xf32, #tpu.memory_space<vmem>>, %arg9: memref<64x4xf32, #tpu.memory_space<vmem>>, %arg10: memref<1x4xf32, #tpu.memory_space<vmem>>, %arg11: memref<2x4xf32, #tpu.memory_space<vmem>>) attributes {dimension_semantics = [], scalar_prefetch = 0 : i64, scratch_operands = 0 : i64, tpu.core_type = #tpu.core_type<tc>} {
    %c0 = arith.constant 0 : index
    %c0_0 = arith.constant 0 : index
    %0 = vector.load %arg1[%c0, %c0_0] : memref<16x128xbf16, #tpu.memory_space<vmem>>, vector<16x128xbf16>
    %c0_1 = arith.constant 0 : index
    %c0_2 = arith.constant 0 : index
    %1 = vector.load %arg4[%c0_1, %c0_2] : memref<32x128xbf16, #tpu.memory_space<vmem>>, vector<32x128xbf16>
    %c0_3 = arith.constant 0 : index
    %c0_4 = arith.constant 0 : index
    %2 = vector.load %arg2[%c0_3, %c0_4] : memref<32x128xbf16, #tpu.memory_space<vmem>>, vector<32x128xbf16>
    %c0_5 = arith.constant 0 : index
    %c0_6 = arith.constant 0 : index
    %3 = vector.load %arg5[%c0_5, %c0_6] : memref<32x128xbf16, #tpu.memory_space<vmem>>, vector<32x128xbf16>
    %c0_7 = arith.constant 0 : index
    %c0_8 = arith.constant 0 : index
    %4 = vector.load %arg3[%c0_7, %c0_8] : memref<1x128xf32, #tpu.memory_space<vmem>>, vector<1x128xf32>
    %c0_9 = arith.constant 0 : index
    %c0_10 = arith.constant 0 : index
    %5 = vector.load %arg6[%c0_9, %c0_10] : memref<1x128xf32, #tpu.memory_space<vmem>>, vector<1x128xf32>
    %c0_11 = arith.constant 0 : index
    %c0_12 = arith.constant 0 : index
    %6 = vector.load %arg0[%c0_11, %c0_12] : memref<16x16xbf16, #tpu.memory_space<vmem>>, vector<16x16xbf16>
    %cst = arith.constant dense<0.000000e+00> : vector<16x128xf32>
    %7 = tpu.matmul %6, %0, %cst {dimension_numbers = #tpu.dot_dimension_numbers<[1], [0], [0], [1], [0, 0, 1, 1], [], []>} : vector<16x16xbf16>, vector<16x128xbf16>, vector<16x128xf32> -> vector<16x128xf32>
    %8 = vector.broadcast %4 : vector<1x128xf32> to vector<16x128xf32>
    %9 = arith.addf %7, %8 : vector<16x128xf32>
    %cst_13 = arith.constant 0.000000e+00 : f32
    %10 = vector.broadcast %cst_13 : f32 to vector<2x32xf32>
    %11 = arith.truncf %10 : vector<2x32xf32> to vector<2x32xbf16>
    %cst_14 = arith.constant dense<0.000000e+00> : vector<2x128xf32>
    %12 = tpu.matmul %11, %2, %cst_14 {dimension_numbers = #tpu.dot_dimension_numbers<[1], [0], [0], [1], [0, 0, 1, 1], [], []>} : vector<2x32xbf16>, vector<32x128xbf16>, vector<2x128xf32> -> vector<2x128xf32>
    %13 = vector.extract_strided_slice %9 {offsets = [0, 0], sizes = [2, 128], strides = [1, 1]} : vector<16x128xf32> to vector<2x128xf32>
    %14 = arith.addf %13, %12 : vector<2x128xf32>
    %cst_15 = arith.constant 5.000000e-01 : f32
    %15 = vector.broadcast %cst_15 : f32 to vector<2x128xf32>
    %16 = arith.mulf %15, %14 : vector<2x128xf32>
    %17 = math.tanh %16 : vector<2x128xf32>
    %cst_16 = arith.constant 1.000000e+00 : f32
    %18 = vector.broadcast %cst_16 : f32 to vector<2x128xf32>
    %19 = arith.addf %17, %18 : vector<2x128xf32>
    %cst_17 = arith.constant 5.000000e-01 : f32
    %20 = vector.broadcast %cst_17 : f32 to vector<2x128xf32>
    %21 = arith.mulf %20, %19 : vector<2x128xf32>
    %22 = math.tanh %14 : vector<2x128xf32>
    %23 = vector.extract_strided_slice %21 {offsets = [0, 0], sizes = [2, 32], strides = [1, 1]} : vector<2x128xf32> to vector<2x32xf32>
    %24 = vector.extract_strided_slice %21 {offsets = [0, 32], sizes = [2, 32], strides = [1, 1]} : vector<2x128xf32> to vector<2x32xf32>
    %25 = vector.extract_strided_slice %22 {offsets = [0, 64], sizes = [2, 32], strides = [1, 1]} : vector<2x128xf32> to vector<2x32xf32>
    %26 = vector.extract_strided_slice %21 {offsets = [0, 96], sizes = [2, 32], strides = [1, 1]} : vector<2x128xf32> to vector<2x32xf32>
    %27 = arith.mulf %24, %10 : vector<2x32xf32>
    %28 = arith.mulf %23, %25 : vector<2x32xf32>
    %29 = arith.addf %27, %28 : vector<2x32xf32>
    %30 = math.tanh %29 : vector<2x32xf32>
    %31 = arith.mulf %26, %30 : vector<2x32xf32>
    %32 = arith.truncf %10 : vector<2x32xf32> to vector<2x32xbf16>
    %cst_18 = arith.constant dense<0.000000e+00> : vector<2x128xf32>
    %33 = tpu.matmul %32, %3, %cst_18 {dimension_numbers = #tpu.dot_dimension_numbers<[1], [0], [0], [1], [0, 0, 1, 1], [], []>} : vector<2x32xbf16>, vector<32x128xbf16>, vector<2x128xf32> -> vector<2x128xf32>
    %34 = arith.truncf %31 : vector<2x32xf32> to vector<2x32xbf16>
    %cst_19 = arith.constant dense<0.000000e+00> : vector<2x128xf32>
    %35 = tpu.matmul %34, %1, %cst_19 {dimension_numbers = #tpu.dot_dimension_numbers<[1], [0], [0], [1], [0, 0, 1, 1], [], []>} : vector<2x32xbf16>, vector<32x128xbf16>, vector<2x128xf32> -> vector<2x128xf32>
    %36 = vector.broadcast %5 : vector<1x128xf32> to vector<2x128xf32>
    %37 = arith.addf %35, %36 : vector<2x128xf32>
    %38 = arith.addf %37, %33 : vector<2x128xf32>
    %cst_20 = arith.constant 5.000000e-01 : f32
    %39 = vector.broadcast %cst_20 : f32 to vector<2x128xf32>
    %40 = arith.mulf %39, %38 : vector<2x128xf32>
    %41 = math.tanh %40 : vector<2x128xf32>
    %cst_21 = arith.constant 1.000000e+00 : f32
    %42 = vector.broadcast %cst_21 : f32 to vector<2x128xf32>
    %43 = arith.addf %41, %42 : vector<2x128xf32>
    %cst_22 = arith.constant 5.000000e-01 : f32
    %44 = vector.broadcast %cst_22 : f32 to vector<2x128xf32>
    %45 = arith.mulf %44, %43 : vector<2x128xf32>
    %46 = math.tanh %38 : vector<2x128xf32>
    %47 = vector.extract_strided_slice %45 {offsets = [0, 0], sizes = [2, 32], strides = [1, 1]} : vector<2x128xf32> to vector<2x32xf32>
    %48 = vector.extract_strided_slice %45 {offsets = [0, 32], sizes = [2, 32], strides = [1, 1]} : vector<2x128xf32> to vector<2x32xf32>
    %49 = vector.extract_strided_slice %46 {offsets = [0, 64], sizes = [2, 32], strides = [1, 1]} : vector<2x128xf32> to vector<2x32xf32>
    %50 = vector.extract_strided_slice %45 {offsets = [0, 96], sizes = [2, 32], strides = [1, 1]} : vector<2x128xf32> to vector<2x32xf32>
    %51 = arith.mulf %48, %10 : vector<2x32xf32>
    %52 = arith.mulf %47, %49 : vector<2x32xf32>
    %53 = arith.addf %51, %52 : vector<2x32xf32>
    %54 = math.tanh %53 : vector<2x32xf32>
    %55 = arith.mulf %50, %54 : vector<2x32xf32>
    %56 = arith.truncf %31 : vector<2x32xf32> to vector<2x32xbf16>
    %cst_23 = arith.constant dense<0.000000e+00> : vector<2x128xf32>
    %57 = tpu.matmul %56, %2, %cst_23 {dimension_numbers = #tpu.dot_dimension_numbers<[1], [0], [0], [1], [0, 0, 1, 1], [], []>} : vector<2x32xbf16>, vector<32x128xbf16>, vector<2x128xf32> -> vector<2x128xf32>
    %58 = vector.extract_strided_slice %9 {offsets = [2, 0], sizes = [2, 128], strides = [1, 1]} : vector<16x128xf32> to vector<2x128xf32>
    %59 = arith.addf %58, %57 : vector<2x128xf32>
    %cst_24 = arith.constant 5.000000e-01 : f32
    %60 = vector.broadcast %cst_24 : f32 to vector<2x128xf32>
    %61 = arith.mulf %60, %59 : vector<2x128xf32>
    %62 = math.tanh %61 : vector<2x128xf32>
    %cst_25 = arith.constant 1.000000e+00 : f32
    %63 = vector.broadcast %cst_25 : f32 to vector<2x128xf32>
    %64 = arith.addf %62, %63 : vector<2x128xf32>
    %cst_26 = arith.constant 5.000000e-01 : f32
    %65 = vector.broadcast %cst_26 : f32 to vector<2x128xf32>
    %66 = arith.mulf %65, %64 : vector<2x128xf32>
    %67 = math.tanh %59 : vector<2x128xf32>
    %68 = vector.extract_strided_slice %66 {offsets = [0, 0], sizes = [2, 32], strides = [1, 1]} : vector<2x128xf32> to vector<2x32xf32>
    %69 = vector.extract_strided_slice %66 {offsets = [0, 32], sizes = [2, 32], strides = [1, 1]} : vector<2x128xf32> to vector<2x32xf32>
    %70 = vector.extract_strided_slice %67 {offsets = [0, 64], sizes = [2, 32], strides = [1, 1]} : vector<2x128xf32> to vector<2x32xf32>
    %71 = vector.extract_strided_slice %66 {offsets = [0, 96], sizes = [2, 32], strides = [1, 1]} : vector<2x128xf32> to vector<2x32xf32>
    %72 = arith.mulf %69, %29 : vector<2x32xf32>
    %73 = arith.mulf %68, %70 : vector<2x32xf32>
    %74 = arith.addf %72, %73 : vector<2x32xf32>
    %75 = math.tanh %74 : vector<2x32xf32>
    %76 = arith.mulf %71, %75 : vector<2x32xf32>
    %77 = arith.truncf %55 : vector<2x32xf32> to vector<2x32xbf16>
    %cst_27 = arith.constant dense<0.000000e+00> : vector<2x128xf32>
    %78 = tpu.matmul %77, %3, %cst_27 {dimension_numbers = #tpu.dot_dimension_numbers<[1], [0], [0], [1], [0, 0, 1, 1], [], []>} : vector<2x32xbf16>, vector<32x128xbf16>, vector<2x128xf32> -> vector<2x128xf32>
    %79 = arith.truncf %76 : vector<2x32xf32> to vector<2x32xbf16>
    %cst_28 = arith.constant dense<0.000000e+00> : vector<2x128xf32>
    %80 = tpu.matmul %79, %1, %cst_28 {dimension_numbers = #tpu.dot_dimension_numbers<[1], [0], [0], [1], [0, 0, 1, 1], [], []>} : vector<2x32xbf16>, vector<32x128xbf16>, vector<2x128xf32> -> vector<2x128xf32>
    %81 = vector.broadcast %5 : vector<1x128xf32> to vector<2x128xf32>
    %82 = arith.addf %80, %81 : vector<2x128xf32>
    %83 = arith.addf %82, %78 : vector<2x128xf32>
    %cst_29 = arith.constant 5.000000e-01 : f32
    %84 = vector.broadcast %cst_29 : f32 to vector<2x128xf32>
    %85 = arith.mulf %84, %83 : vector<2x128xf32>
    %86 = math.tanh %85 : vector<2x128xf32>
    %cst_30 = arith.constant 1.000000e+00 : f32
    %87 = vector.broadcast %cst_30 : f32 to vector<2x128xf32>
    %88 = arith.addf %86, %87 : vector<2x128xf32>
    %cst_31 = arith.constant 5.000000e-01 : f32
    %89 = vector.broadcast %cst_31 : f32 to vector<2x128xf32>
    %90 = arith.mulf %89, %88 : vector<2x128xf32>
    %91 = math.tanh %83 : vector<2x128xf32>
    %92 = vector.extract_strided_slice %90 {offsets = [0, 0], sizes = [2, 32], strides = [1, 1]} : vector<2x128xf32> to vector<2x32xf32>
    %93 = vector.extract_strided_slice %90 {offsets = [0, 32], sizes = [2, 32], strides = [1, 1]} : vector<2x128xf32> to vector<2x32xf32>
    %94 = vector.extract_strided_slice %91 {offsets = [0, 64], sizes = [2, 32], strides = [1, 1]} : vector<2x128xf32> to vector<2x32xf32>
    %95 = vector.extract_strided_slice %90 {offsets = [0, 96], sizes = [2, 32], strides = [1, 1]} : vector<2x128xf32> to vector<2x32xf32>
    %96 = arith.mulf %93, %53 : vector<2x32xf32>
    %97 = arith.mulf %92, %94 : vector<2x32xf32>
    %98 = arith.addf %96, %97 : vector<2x32xf32>
    %99 = math.tanh %98 : vector<2x32xf32>
    %100 = arith.mulf %95, %99 : vector<2x32xf32>
    %101 = arith.truncf %76 : vector<2x32xf32> to vector<2x32xbf16>
    %cst_32 = arith.constant dense<0.000000e+00> : vector<2x128xf32>
    %102 = tpu.matmul %101, %2, %cst_32 {dimension_numbers = #tpu.dot_dimension_numbers<[1], [0], [0], [1], [0, 0, 1, 1], [], []>} : vector<2x32xbf16>, vector<32x128xbf16>, vector<2x128xf32> -> vector<2x128xf32>
    %103 = vector.extract_strided_slice %9 {offsets = [4, 0], sizes = [2, 128], strides = [1, 1]} : vector<16x128xf32> to vector<2x128xf32>
    %104 = arith.addf %103, %102 : vector<2x128xf32>
    %cst_33 = arith.constant 5.000000e-01 : f32
    %105 = vector.broadcast %cst_33 : f32 to vector<2x128xf32>
    %106 = arith.mulf %105, %104 : vector<2x128xf32>
    %107 = math.tanh %106 : vector<2x128xf32>
    %cst_34 = arith.constant 1.000000e+00 : f32
    %108 = vector.broadcast %cst_34 : f32 to vector<2x128xf32>
    %109 = arith.addf %107, %108 : vector<2x128xf32>
    %cst_35 = arith.constant 5.000000e-01 : f32
    %110 = vector.broadcast %cst_35 : f32 to vector<2x128xf32>
    %111 = arith.mulf %110, %109 : vector<2x128xf32>
    %112 = math.tanh %104 : vector<2x128xf32>
    %113 = vector.extract_strided_slice %111 {offsets = [0, 0], sizes = [2, 32], strides = [1, 1]} : vector<2x128xf32> to vector<2x32xf32>
    %114 = vector.extract_strided_slice %111 {offsets = [0, 32], sizes = [2, 32], strides = [1, 1]} : vector<2x128xf32> to vector<2x32xf32>
    %115 = vector.extract_strided_slice %112 {offsets = [0, 64], sizes = [2, 32], strides = [1, 1]} : vector<2x128xf32> to vector<2x32xf32>
    %116 = vector.extract_strided_slice %111 {offsets = [0, 96], sizes = [2, 32], strides = [1, 1]} : vector<2x128xf32> to vector<2x32xf32>
    %117 = arith.mulf %114, %74 : vector<2x32xf32>
    %118 = arith.mulf %113, %115 : vector<2x32xf32>
    %119 = arith.addf %117, %118 : vector<2x32xf32>
    %120 = math.tanh %119 : vector<2x32xf32>
    %121 = arith.mulf %116, %120 : vector<2x32xf32>
    %122 = arith.truncf %100 : vector<2x32xf32> to vector<2x32xbf16>
    %cst_36 = arith.constant dense<0.000000e+00> : vector<2x128xf32>
    %123 = tpu.matmul %122, %3, %cst_36 {dimension_numbers = #tpu.dot_dimension_numbers<[1], [0], [0], [1], [0, 0, 1, 1], [], []>} : vector<2x32xbf16>, vector<32x128xbf16>, vector<2x128xf32> -> vector<2x128xf32>
    %124 = arith.truncf %121 : vector<2x32xf32> to vector<2x32xbf16>
    %cst_37 = arith.constant dense<0.000000e+00> : vector<2x128xf32>
    %125 = tpu.matmul %124, %1, %cst_37 {dimension_numbers = #tpu.dot_dimension_numbers<[1], [0], [0], [1], [0, 0, 1, 1], [], []>} : vector<2x32xbf16>, vector<32x128xbf16>, vector<2x128xf32> -> vector<2x128xf32>
    %126 = vector.broadcast %5 : vector<1x128xf32> to vector<2x128xf32>
    %127 = arith.addf %125, %126 : vector<2x128xf32>
    %128 = arith.addf %127, %123 : vector<2x128xf32>
    %cst_38 = arith.constant 5.000000e-01 : f32
    %129 = vector.broadcast %cst_38 : f32 to vector<2x128xf32>
    %130 = arith.mulf %129, %128 : vector<2x128xf32>
    %131 = math.tanh %130 : vector<2x128xf32>
    %cst_39 = arith.constant 1.000000e+00 : f32
    %132 = vector.broadcast %cst_39 : f32 to vector<2x128xf32>
    %133 = arith.addf %131, %132 : vector<2x128xf32>
    %cst_40 = arith.constant 5.000000e-01 : f32
    %134 = vector.broadcast %cst_40 : f32 to vector<2x128xf32>
    %135 = arith.mulf %134, %133 : vector<2x128xf32>
    %136 = math.tanh %128 : vector<2x128xf32>
    %137 = vector.extract_strided_slice %135 {offsets = [0, 0], sizes = [2, 32], strides = [1, 1]} : vector<2x128xf32> to vector<2x32xf32>
    %138 = vector.extract_strided_slice %135 {offsets = [0, 32], sizes = [2, 32], strides = [1, 1]} : vector<2x128xf32> to vector<2x32xf32>
    %139 = vector.extract_strided_slice %136 {offsets = [0, 64], sizes = [2, 32], strides = [1, 1]} : vector<2x128xf32> to vector<2x32xf32>
    %140 = vector.extract_strided_slice %135 {offsets = [0, 96], sizes = [2, 32], strides = [1, 1]} : vector<2x128xf32> to vector<2x32xf32>
    %141 = arith.mulf %138, %98 : vector<2x32xf32>
    %142 = arith.mulf %137, %139 : vector<2x32xf32>
    %143 = arith.addf %141, %142 : vector<2x32xf32>
    %144 = math.tanh %143 : vector<2x32xf32>
    %145 = arith.mulf %140, %144 : vector<2x32xf32>
    %146 = arith.truncf %121 : vector<2x32xf32> to vector<2x32xbf16>
    %cst_41 = arith.constant dense<0.000000e+00> : vector<2x128xf32>
    %147 = tpu.matmul %146, %2, %cst_41 {dimension_numbers = #tpu.dot_dimension_numbers<[1], [0], [0], [1], [0, 0, 1, 1], [], []>} : vector<2x32xbf16>, vector<32x128xbf16>, vector<2x128xf32> -> vector<2x128xf32>
    %148 = vector.extract_strided_slice %9 {offsets = [6, 0], sizes = [2, 128], strides = [1, 1]} : vector<16x128xf32> to vector<2x128xf32>
    %149 = arith.addf %148, %147 : vector<2x128xf32>
    %cst_42 = arith.constant 5.000000e-01 : f32
    %150 = vector.broadcast %cst_42 : f32 to vector<2x128xf32>
    %151 = arith.mulf %150, %149 : vector<2x128xf32>
    %152 = math.tanh %151 : vector<2x128xf32>
    %cst_43 = arith.constant 1.000000e+00 : f32
    %153 = vector.broadcast %cst_43 : f32 to vector<2x128xf32>
    %154 = arith.addf %152, %153 : vector<2x128xf32>
    %cst_44 = arith.constant 5.000000e-01 : f32
    %155 = vector.broadcast %cst_44 : f32 to vector<2x128xf32>
    %156 = arith.mulf %155, %154 : vector<2x128xf32>
    %157 = math.tanh %149 : vector<2x128xf32>
    %158 = vector.extract_strided_slice %156 {offsets = [0, 0], sizes = [2, 32], strides = [1, 1]} : vector<2x128xf32> to vector<2x32xf32>
    %159 = vector.extract_strided_slice %156 {offsets = [0, 32], sizes = [2, 32], strides = [1, 1]} : vector<2x128xf32> to vector<2x32xf32>
    %160 = vector.extract_strided_slice %157 {offsets = [0, 64], sizes = [2, 32], strides = [1, 1]} : vector<2x128xf32> to vector<2x32xf32>
    %161 = vector.extract_strided_slice %156 {offsets = [0, 96], sizes = [2, 32], strides = [1, 1]} : vector<2x128xf32> to vector<2x32xf32>
    %162 = arith.mulf %159, %119 : vector<2x32xf32>
    %163 = arith.mulf %158, %160 : vector<2x32xf32>
    %164 = arith.addf %162, %163 : vector<2x32xf32>
    %165 = math.tanh %164 : vector<2x32xf32>
    %166 = arith.mulf %161, %165 : vector<2x32xf32>
    %167 = arith.truncf %145 : vector<2x32xf32> to vector<2x32xbf16>
    %cst_45 = arith.constant dense<0.000000e+00> : vector<2x128xf32>
    %168 = tpu.matmul %167, %3, %cst_45 {dimension_numbers = #tpu.dot_dimension_numbers<[1], [0], [0], [1], [0, 0, 1, 1], [], []>} : vector<2x32xbf16>, vector<32x128xbf16>, vector<2x128xf32> -> vector<2x128xf32>
    %169 = arith.truncf %166 : vector<2x32xf32> to vector<2x32xbf16>
    %cst_46 = arith.constant dense<0.000000e+00> : vector<2x128xf32>
    %170 = tpu.matmul %169, %1, %cst_46 {dimension_numbers = #tpu.dot_dimension_numbers<[1], [0], [0], [1], [0, 0, 1, 1], [], []>} : vector<2x32xbf16>, vector<32x128xbf16>, vector<2x128xf32> -> vector<2x128xf32>
    %171 = vector.broadcast %5 : vector<1x128xf32> to vector<2x128xf32>
    %172 = arith.addf %170, %171 : vector<2x128xf32>
    %173 = arith.addf %172, %168 : vector<2x128xf32>
    %cst_47 = arith.constant 5.000000e-01 : f32
    %174 = vector.broadcast %cst_47 : f32 to vector<2x128xf32>
    %175 = arith.mulf %174, %173 : vector<2x128xf32>
    %176 = math.tanh %175 : vector<2x128xf32>
    %cst_48 = arith.constant 1.000000e+00 : f32
    %177 = vector.broadcast %cst_48 : f32 to vector<2x128xf32>
    %178 = arith.addf %176, %177 : vector<2x128xf32>
    %cst_49 = arith.constant 5.000000e-01 : f32
    %179 = vector.broadcast %cst_49 : f32 to vector<2x128xf32>
    %180 = arith.mulf %179, %178 : vector<2x128xf32>
    %181 = math.tanh %173 : vector<2x128xf32>
    %182 = vector.extract_strided_slice %180 {offsets = [0, 0], sizes = [2, 32], strides = [1, 1]} : vector<2x128xf32> to vector<2x32xf32>
    %183 = vector.extract_strided_slice %180 {offsets = [0, 32], sizes = [2, 32], strides = [1, 1]} : vector<2x128xf32> to vector<2x32xf32>
    %184 = vector.extract_strided_slice %181 {offsets = [0, 64], sizes = [2, 32], strides = [1, 1]} : vector<2x128xf32> to vector<2x32xf32>
    %185 = vector.extract_strided_slice %180 {offsets = [0, 96], sizes = [2, 32], strides = [1, 1]} : vector<2x128xf32> to vector<2x32xf32>
    %186 = arith.mulf %183, %143 : vector<2x32xf32>
    %187 = arith.mulf %182, %184 : vector<2x32xf32>
    %188 = arith.addf %186, %187 : vector<2x32xf32>
    %189 = math.tanh %188 : vector<2x32xf32>
    %190 = arith.mulf %185, %189 : vector<2x32xf32>
    %191 = arith.truncf %166 : vector<2x32xf32> to vector<2x32xbf16>
    %cst_50 = arith.constant dense<0.000000e+00> : vector<2x128xf32>
    %192 = tpu.matmul %191, %2, %cst_50 {dimension_numbers = #tpu.dot_dimension_numbers<[1], [0], [0], [1], [0, 0, 1, 1], [], []>} : vector<2x32xbf16>, vector<32x128xbf16>, vector<2x128xf32> -> vector<2x128xf32>
    %193 = vector.extract_strided_slice %9 {offsets = [8, 0], sizes = [2, 128], strides = [1, 1]} : vector<16x128xf32> to vector<2x128xf32>
    %194 = arith.addf %193, %192 : vector<2x128xf32>
    %cst_51 = arith.constant 5.000000e-01 : f32
    %195 = vector.broadcast %cst_51 : f32 to vector<2x128xf32>
    %196 = arith.mulf %195, %194 : vector<2x128xf32>
    %197 = math.tanh %196 : vector<2x128xf32>
    %cst_52 = arith.constant 1.000000e+00 : f32
    %198 = vector.broadcast %cst_52 : f32 to vector<2x128xf32>
    %199 = arith.addf %197, %198 : vector<2x128xf32>
    %cst_53 = arith.constant 5.000000e-01 : f32
    %200 = vector.broadcast %cst_53 : f32 to vector<2x128xf32>
    %201 = arith.mulf %200, %199 : vector<2x128xf32>
    %202 = math.tanh %194 : vector<2x128xf32>
    %203 = vector.extract_strided_slice %201 {offsets = [0, 0], sizes = [2, 32], strides = [1, 1]} : vector<2x128xf32> to vector<2x32xf32>
    %204 = vector.extract_strided_slice %201 {offsets = [0, 32], sizes = [2, 32], strides = [1, 1]} : vector<2x128xf32> to vector<2x32xf32>
    %205 = vector.extract_strided_slice %202 {offsets = [0, 64], sizes = [2, 32], strides = [1, 1]} : vector<2x128xf32> to vector<2x32xf32>
    %206 = vector.extract_strided_slice %201 {offsets = [0, 96], sizes = [2, 32], strides = [1, 1]} : vector<2x128xf32> to vector<2x32xf32>
    %207 = arith.mulf %204, %164 : vector<2x32xf32>
    %208 = arith.mulf %203, %205 : vector<2x32xf32>
    %209 = arith.addf %207, %208 : vector<2x32xf32>
    %210 = math.tanh %209 : vector<2x32xf32>
    %211 = arith.mulf %206, %210 : vector<2x32xf32>
    %212 = arith.truncf %190 : vector<2x32xf32> to vector<2x32xbf16>
    %cst_54 = arith.constant dense<0.000000e+00> : vector<2x128xf32>
    %213 = tpu.matmul %212, %3, %cst_54 {dimension_numbers = #tpu.dot_dimension_numbers<[1], [0], [0], [1], [0, 0, 1, 1], [], []>} : vector<2x32xbf16>, vector<32x128xbf16>, vector<2x128xf32> -> vector<2x128xf32>
    %214 = arith.truncf %211 : vector<2x32xf32> to vector<2x32xbf16>
    %cst_55 = arith.constant dense<0.000000e+00> : vector<2x128xf32>
    %215 = tpu.matmul %214, %1, %cst_55 {dimension_numbers = #tpu.dot_dimension_numbers<[1], [0], [0], [1], [0, 0, 1, 1], [], []>} : vector<2x32xbf16>, vector<32x128xbf16>, vector<2x128xf32> -> vector<2x128xf32>
    %216 = vector.broadcast %5 : vector<1x128xf32> to vector<2x128xf32>
    %217 = arith.addf %215, %216 : vector<2x128xf32>
    %218 = arith.addf %217, %213 : vector<2x128xf32>
    %cst_56 = arith.constant 5.000000e-01 : f32
    %219 = vector.broadcast %cst_56 : f32 to vector<2x128xf32>
    %220 = arith.mulf %219, %218 : vector<2x128xf32>
    %221 = math.tanh %220 : vector<2x128xf32>
    %cst_57 = arith.constant 1.000000e+00 : f32
    %222 = vector.broadcast %cst_57 : f32 to vector<2x128xf32>
    %223 = arith.addf %221, %222 : vector<2x128xf32>
    %cst_58 = arith.constant 5.000000e-01 : f32
    %224 = vector.broadcast %cst_58 : f32 to vector<2x128xf32>
    %225 = arith.mulf %224, %223 : vector<2x128xf32>
    %226 = math.tanh %218 : vector<2x128xf32>
    %227 = vector.extract_strided_slice %225 {offsets = [0, 0], sizes = [2, 32], strides = [1, 1]} : vector<2x128xf32> to vector<2x32xf32>
    %228 = vector.extract_strided_slice %225 {offsets = [0, 32], sizes = [2, 32], strides = [1, 1]} : vector<2x128xf32> to vector<2x32xf32>
    %229 = vector.extract_strided_slice %226 {offsets = [0, 64], sizes = [2, 32], strides = [1, 1]} : vector<2x128xf32> to vector<2x32xf32>
    %230 = vector.extract_strided_slice %225 {offsets = [0, 96], sizes = [2, 32], strides = [1, 1]} : vector<2x128xf32> to vector<2x32xf32>
    %231 = arith.mulf %228, %188 : vector<2x32xf32>
    %232 = arith.mulf %227, %229 : vector<2x32xf32>
    %233 = arith.addf %231, %232 : vector<2x32xf32>
    %234 = math.tanh %233 : vector<2x32xf32>
    %235 = arith.mulf %230, %234 : vector<2x32xf32>
    %236 = arith.truncf %211 : vector<2x32xf32> to vector<2x32xbf16>
    %cst_59 = arith.constant dense<0.000000e+00> : vector<2x128xf32>
    %237 = tpu.matmul %236, %2, %cst_59 {dimension_numbers = #tpu.dot_dimension_numbers<[1], [0], [0], [1], [0, 0, 1, 1], [], []>} : vector<2x32xbf16>, vector<32x128xbf16>, vector<2x128xf32> -> vector<2x128xf32>
    %238 = vector.extract_strided_slice %9 {offsets = [10, 0], sizes = [2, 128], strides = [1, 1]} : vector<16x128xf32> to vector<2x128xf32>
    %239 = arith.addf %238, %237 : vector<2x128xf32>
    %cst_60 = arith.constant 5.000000e-01 : f32
    %240 = vector.broadcast %cst_60 : f32 to vector<2x128xf32>
    %241 = arith.mulf %240, %239 : vector<2x128xf32>
    %242 = math.tanh %241 : vector<2x128xf32>
    %cst_61 = arith.constant 1.000000e+00 : f32
    %243 = vector.broadcast %cst_61 : f32 to vector<2x128xf32>
    %244 = arith.addf %242, %243 : vector<2x128xf32>
    %cst_62 = arith.constant 5.000000e-01 : f32
    %245 = vector.broadcast %cst_62 : f32 to vector<2x128xf32>
    %246 = arith.mulf %245, %244 : vector<2x128xf32>
    %247 = math.tanh %239 : vector<2x128xf32>
    %248 = vector.extract_strided_slice %246 {offsets = [0, 0], sizes = [2, 32], strides = [1, 1]} : vector<2x128xf32> to vector<2x32xf32>
    %249 = vector.extract_strided_slice %246 {offsets = [0, 32], sizes = [2, 32], strides = [1, 1]} : vector<2x128xf32> to vector<2x32xf32>
    %250 = vector.extract_strided_slice %247 {offsets = [0, 64], sizes = [2, 32], strides = [1, 1]} : vector<2x128xf32> to vector<2x32xf32>
    %251 = vector.extract_strided_slice %246 {offsets = [0, 96], sizes = [2, 32], strides = [1, 1]} : vector<2x128xf32> to vector<2x32xf32>
    %252 = arith.mulf %249, %209 : vector<2x32xf32>
    %253 = arith.mulf %248, %250 : vector<2x32xf32>
    %254 = arith.addf %252, %253 : vector<2x32xf32>
    %255 = math.tanh %254 : vector<2x32xf32>
    %256 = arith.mulf %251, %255 : vector<2x32xf32>
    %257 = arith.truncf %235 : vector<2x32xf32> to vector<2x32xbf16>
    %cst_63 = arith.constant dense<0.000000e+00> : vector<2x128xf32>
    %258 = tpu.matmul %257, %3, %cst_63 {dimension_numbers = #tpu.dot_dimension_numbers<[1], [0], [0], [1], [0, 0, 1, 1], [], []>} : vector<2x32xbf16>, vector<32x128xbf16>, vector<2x128xf32> -> vector<2x128xf32>
    %259 = arith.truncf %256 : vector<2x32xf32> to vector<2x32xbf16>
    %cst_64 = arith.constant dense<0.000000e+00> : vector<2x128xf32>
    %260 = tpu.matmul %259, %1, %cst_64 {dimension_numbers = #tpu.dot_dimension_numbers<[1], [0], [0], [1], [0, 0, 1, 1], [], []>} : vector<2x32xbf16>, vector<32x128xbf16>, vector<2x128xf32> -> vector<2x128xf32>
    %261 = vector.broadcast %5 : vector<1x128xf32> to vector<2x128xf32>
    %262 = arith.addf %260, %261 : vector<2x128xf32>
    %263 = arith.addf %262, %258 : vector<2x128xf32>
    %cst_65 = arith.constant 5.000000e-01 : f32
    %264 = vector.broadcast %cst_65 : f32 to vector<2x128xf32>
    %265 = arith.mulf %264, %263 : vector<2x128xf32>
    %266 = math.tanh %265 : vector<2x128xf32>
    %cst_66 = arith.constant 1.000000e+00 : f32
    %267 = vector.broadcast %cst_66 : f32 to vector<2x128xf32>
    %268 = arith.addf %266, %267 : vector<2x128xf32>
    %cst_67 = arith.constant 5.000000e-01 : f32
    %269 = vector.broadcast %cst_67 : f32 to vector<2x128xf32>
    %270 = arith.mulf %269, %268 : vector<2x128xf32>
    %271 = math.tanh %263 : vector<2x128xf32>
    %272 = vector.extract_strided_slice %270 {offsets = [0, 0], sizes = [2, 32], strides = [1, 1]} : vector<2x128xf32> to vector<2x32xf32>
    %273 = vector.extract_strided_slice %270 {offsets = [0, 32], sizes = [2, 32], strides = [1, 1]} : vector<2x128xf32> to vector<2x32xf32>
    %274 = vector.extract_strided_slice %271 {offsets = [0, 64], sizes = [2, 32], strides = [1, 1]} : vector<2x128xf32> to vector<2x32xf32>
    %275 = vector.extract_strided_slice %270 {offsets = [0, 96], sizes = [2, 32], strides = [1, 1]} : vector<2x128xf32> to vector<2x32xf32>
    %276 = arith.mulf %273, %233 : vector<2x32xf32>
    %277 = arith.mulf %272, %274 : vector<2x32xf32>
    %278 = arith.addf %276, %277 : vector<2x32xf32>
    %279 = math.tanh %278 : vector<2x32xf32>
    %280 = arith.mulf %275, %279 : vector<2x32xf32>
    %281 = arith.truncf %256 : vector<2x32xf32> to vector<2x32xbf16>
    %cst_68 = arith.constant dense<0.000000e+00> : vector<2x128xf32>
    %282 = tpu.matmul %281, %2, %cst_68 {dimension_numbers = #tpu.dot_dimension_numbers<[1], [0], [0], [1], [0, 0, 1, 1], [], []>} : vector<2x32xbf16>, vector<32x128xbf16>, vector<2x128xf32> -> vector<2x128xf32>
    %283 = vector.extract_strided_slice %9 {offsets = [12, 0], sizes = [2, 128], strides = [1, 1]} : vector<16x128xf32> to vector<2x128xf32>
    %284 = arith.addf %283, %282 : vector<2x128xf32>
    %cst_69 = arith.constant 5.000000e-01 : f32
    %285 = vector.broadcast %cst_69 : f32 to vector<2x128xf32>
    %286 = arith.mulf %285, %284 : vector<2x128xf32>
    %287 = math.tanh %286 : vector<2x128xf32>
    %cst_70 = arith.constant 1.000000e+00 : f32
    %288 = vector.broadcast %cst_70 : f32 to vector<2x128xf32>
    %289 = arith.addf %287, %288 : vector<2x128xf32>
    %cst_71 = arith.constant 5.000000e-01 : f32
    %290 = vector.broadcast %cst_71 : f32 to vector<2x128xf32>
    %291 = arith.mulf %290, %289 : vector<2x128xf32>
    %292 = math.tanh %284 : vector<2x128xf32>
    %293 = vector.extract_strided_slice %291 {offsets = [0, 0], sizes = [2, 32], strides = [1, 1]} : vector<2x128xf32> to vector<2x32xf32>
    %294 = vector.extract_strided_slice %291 {offsets = [0, 32], sizes = [2, 32], strides = [1, 1]} : vector<2x128xf32> to vector<2x32xf32>
    %295 = vector.extract_strided_slice %292 {offsets = [0, 64], sizes = [2, 32], strides = [1, 1]} : vector<2x128xf32> to vector<2x32xf32>
    %296 = vector.extract_strided_slice %291 {offsets = [0, 96], sizes = [2, 32], strides = [1, 1]} : vector<2x128xf32> to vector<2x32xf32>
    %297 = arith.mulf %294, %254 : vector<2x32xf32>
    %298 = arith.mulf %293, %295 : vector<2x32xf32>
    %299 = arith.addf %297, %298 : vector<2x32xf32>
    %300 = math.tanh %299 : vector<2x32xf32>
    %301 = arith.mulf %296, %300 : vector<2x32xf32>
    %302 = arith.truncf %280 : vector<2x32xf32> to vector<2x32xbf16>
    %cst_72 = arith.constant dense<0.000000e+00> : vector<2x128xf32>
    %303 = tpu.matmul %302, %3, %cst_72 {dimension_numbers = #tpu.dot_dimension_numbers<[1], [0], [0], [1], [0, 0, 1, 1], [], []>} : vector<2x32xbf16>, vector<32x128xbf16>, vector<2x128xf32> -> vector<2x128xf32>
    %304 = arith.truncf %301 : vector<2x32xf32> to vector<2x32xbf16>
    %cst_73 = arith.constant dense<0.000000e+00> : vector<2x128xf32>
    %305 = tpu.matmul %304, %1, %cst_73 {dimension_numbers = #tpu.dot_dimension_numbers<[1], [0], [0], [1], [0, 0, 1, 1], [], []>} : vector<2x32xbf16>, vector<32x128xbf16>, vector<2x128xf32> -> vector<2x128xf32>
    %306 = vector.broadcast %5 : vector<1x128xf32> to vector<2x128xf32>
    %307 = arith.addf %305, %306 : vector<2x128xf32>
    %308 = arith.addf %307, %303 : vector<2x128xf32>
    %cst_74 = arith.constant 5.000000e-01 : f32
    %309 = vector.broadcast %cst_74 : f32 to vector<2x128xf32>
    %310 = arith.mulf %309, %308 : vector<2x128xf32>
    %311 = math.tanh %310 : vector<2x128xf32>
    %cst_75 = arith.constant 1.000000e+00 : f32
    %312 = vector.broadcast %cst_75 : f32 to vector<2x128xf32>
    %313 = arith.addf %311, %312 : vector<2x128xf32>
    %cst_76 = arith.constant 5.000000e-01 : f32
    %314 = vector.broadcast %cst_76 : f32 to vector<2x128xf32>
    %315 = arith.mulf %314, %313 : vector<2x128xf32>
    %316 = math.tanh %308 : vector<2x128xf32>
    %317 = vector.extract_strided_slice %315 {offsets = [0, 0], sizes = [2, 32], strides = [1, 1]} : vector<2x128xf32> to vector<2x32xf32>
    %318 = vector.extract_strided_slice %315 {offsets = [0, 32], sizes = [2, 32], strides = [1, 1]} : vector<2x128xf32> to vector<2x32xf32>
    %319 = vector.extract_strided_slice %316 {offsets = [0, 64], sizes = [2, 32], strides = [1, 1]} : vector<2x128xf32> to vector<2x32xf32>
    %320 = vector.extract_strided_slice %315 {offsets = [0, 96], sizes = [2, 32], strides = [1, 1]} : vector<2x128xf32> to vector<2x32xf32>
    %321 = arith.mulf %318, %278 : vector<2x32xf32>
    %322 = arith.mulf %317, %319 : vector<2x32xf32>
    %323 = arith.addf %321, %322 : vector<2x32xf32>
    %324 = math.tanh %323 : vector<2x32xf32>
    %325 = arith.mulf %320, %324 : vector<2x32xf32>
    %326 = arith.truncf %301 : vector<2x32xf32> to vector<2x32xbf16>
    %cst_77 = arith.constant dense<0.000000e+00> : vector<2x128xf32>
    %327 = tpu.matmul %326, %2, %cst_77 {dimension_numbers = #tpu.dot_dimension_numbers<[1], [0], [0], [1], [0, 0, 1, 1], [], []>} : vector<2x32xbf16>, vector<32x128xbf16>, vector<2x128xf32> -> vector<2x128xf32>
    %328 = vector.extract_strided_slice %9 {offsets = [14, 0], sizes = [2, 128], strides = [1, 1]} : vector<16x128xf32> to vector<2x128xf32>
    %329 = arith.addf %328, %327 : vector<2x128xf32>
    %cst_78 = arith.constant 5.000000e-01 : f32
    %330 = vector.broadcast %cst_78 : f32 to vector<2x128xf32>
    %331 = arith.mulf %330, %329 : vector<2x128xf32>
    %332 = math.tanh %331 : vector<2x128xf32>
    %cst_79 = arith.constant 1.000000e+00 : f32
    %333 = vector.broadcast %cst_79 : f32 to vector<2x128xf32>
    %334 = arith.addf %332, %333 : vector<2x128xf32>
    %cst_80 = arith.constant 5.000000e-01 : f32
    %335 = vector.broadcast %cst_80 : f32 to vector<2x128xf32>
    %336 = arith.mulf %335, %334 : vector<2x128xf32>
    %337 = math.tanh %329 : vector<2x128xf32>
    %338 = vector.extract_strided_slice %336 {offsets = [0, 0], sizes = [2, 32], strides = [1, 1]} : vector<2x128xf32> to vector<2x32xf32>
    %339 = vector.extract_strided_slice %336 {offsets = [0, 32], sizes = [2, 32], strides = [1, 1]} : vector<2x128xf32> to vector<2x32xf32>
    %340 = vector.extract_strided_slice %337 {offsets = [0, 64], sizes = [2, 32], strides = [1, 1]} : vector<2x128xf32> to vector<2x32xf32>
    %341 = vector.extract_strided_slice %336 {offsets = [0, 96], sizes = [2, 32], strides = [1, 1]} : vector<2x128xf32> to vector<2x32xf32>
    %342 = arith.mulf %339, %299 : vector<2x32xf32>
    %343 = arith.mulf %338, %340 : vector<2x32xf32>
    %344 = arith.addf %342, %343 : vector<2x32xf32>
    %345 = math.tanh %344 : vector<2x32xf32>
    %346 = arith.mulf %341, %345 : vector<2x32xf32>
    %347 = arith.truncf %325 : vector<2x32xf32> to vector<2x32xbf16>
    %cst_81 = arith.constant dense<0.000000e+00> : vector<2x128xf32>
    %348 = tpu.matmul %347, %3, %cst_81 {dimension_numbers = #tpu.dot_dimension_numbers<[1], [0], [0], [1], [0, 0, 1, 1], [], []>} : vector<2x32xbf16>, vector<32x128xbf16>, vector<2x128xf32> -> vector<2x128xf32>
    %349 = arith.truncf %346 : vector<2x32xf32> to vector<2x32xbf16>
    %cst_82 = arith.constant dense<0.000000e+00> : vector<2x128xf32>
    %350 = tpu.matmul %349, %1, %cst_82 {dimension_numbers = #tpu.dot_dimension_numbers<[1], [0], [0], [1], [0, 0, 1, 1], [], []>} : vector<2x32xbf16>, vector<32x128xbf16>, vector<2x128xf32> -> vector<2x128xf32>
    %351 = vector.broadcast %5 : vector<1x128xf32> to vector<2x128xf32>
    %352 = arith.addf %350, %351 : vector<2x128xf32>
    %353 = arith.addf %352, %348 : vector<2x128xf32>
    %cst_83 = arith.constant 5.000000e-01 : f32
    %354 = vector.broadcast %cst_83 : f32 to vector<2x128xf32>
    %355 = arith.mulf %354, %353 : vector<2x128xf32>
    %356 = math.tanh %355 : vector<2x128xf32>
    %cst_84 = arith.constant 1.000000e+00 : f32
    %357 = vector.broadcast %cst_84 : f32 to vector<2x128xf32>
    %358 = arith.addf %356, %357 : vector<2x128xf32>
    %cst_85 = arith.constant 5.000000e-01 : f32
    %359 = vector.broadcast %cst_85 : f32 to vector<2x128xf32>
    %360 = arith.mulf %359, %358 : vector<2x128xf32>
    %361 = math.tanh %353 : vector<2x128xf32>
    %362 = vector.extract_strided_slice %360 {offsets = [0, 0], sizes = [2, 32], strides = [1, 1]} : vector<2x128xf32> to vector<2x32xf32>
    %363 = vector.extract_strided_slice %360 {offsets = [0, 32], sizes = [2, 32], strides = [1, 1]} : vector<2x128xf32> to vector<2x32xf32>
    %364 = vector.extract_strided_slice %361 {offsets = [0, 64], sizes = [2, 32], strides = [1, 1]} : vector<2x128xf32> to vector<2x32xf32>
    %365 = vector.extract_strided_slice %360 {offsets = [0, 96], sizes = [2, 32], strides = [1, 1]} : vector<2x128xf32> to vector<2x32xf32>
    %366 = arith.mulf %363, %323 : vector<2x32xf32>
    %367 = arith.mulf %362, %364 : vector<2x32xf32>
    %368 = arith.addf %366, %367 : vector<2x32xf32>
    %369 = math.tanh %368 : vector<2x32xf32>
    %370 = arith.mulf %365, %369 : vector<2x32xf32>
    %c0_86 = arith.constant 0 : index
    %c0_87 = arith.constant 0 : index
    %371 = vector.load %arg7[%c0_86, %c0_87] : memref<32x64xf32, #tpu.memory_space<vmem>>, vector<32x64xf32>
    %cst_88 = arith.constant dense<0.000000e+00> : vector<2x64xf32>
    %372 = tpu.matmul %370, %371, %cst_88 {dimension_numbers = #tpu.dot_dimension_numbers<[1], [0], [0], [1], [0, 0, 1, 1], [], []>} : vector<2x32xf32>, vector<32x64xf32>, vector<2x64xf32> -> vector<2x64xf32>
    %c0_89 = arith.constant 0 : index
    %c0_90 = arith.constant 0 : index
    %373 = vector.load %arg8[%c0_89, %c0_90] : memref<1x64xf32, #tpu.memory_space<vmem>>, vector<1x64xf32>
    %374 = vector.broadcast %373 : vector<1x64xf32> to vector<2x64xf32>
    %375 = arith.addf %372, %374 : vector<2x64xf32>
    %cst_91 = arith.constant 0.000000e+00 : f32
    %376 = vector.broadcast %cst_91 : f32 to vector<2x64xf32>
    %377 = arith.maximumf %375, %376 : vector<2x64xf32>
    %c0_92 = arith.constant 0 : index
    %c0_93 = arith.constant 0 : index
    %378 = vector.load %arg9[%c0_92, %c0_93] : memref<64x4xf32, #tpu.memory_space<vmem>>, vector<64x4xf32>
    %cst_94 = arith.constant dense<0.000000e+00> : vector<2x4xf32>
    %379 = tpu.matmul %377, %378, %cst_94 {dimension_numbers = #tpu.dot_dimension_numbers<[1], [0], [0], [1], [0, 0, 1, 1], [], []>} : vector<2x64xf32>, vector<64x4xf32>, vector<2x4xf32> -> vector<2x4xf32>
    %c0_95 = arith.constant 0 : index
    %c0_96 = arith.constant 0 : index
    %380 = vector.load %arg10[%c0_95, %c0_96] : memref<1x4xf32, #tpu.memory_space<vmem>>, vector<1x4xf32>
    %381 = vector.broadcast %380 : vector<1x4xf32> to vector<2x4xf32>
    %382 = arith.addf %379, %381 : vector<2x4xf32>
    %c0_97 = arith.constant 0 : index
    %c0_98 = arith.constant 0 : index
    %383 = vector.load %arg11[%c0_97, %c0_98] : memref<2x4xf32, #tpu.memory_space<vmem>>, vector<2x4xf32>
    tpu.vector_store %arg11[%c0_97, %c0_98], %382 {strides = array<i32>} : memref<2x4xf32, #tpu.memory_space<vmem>>, vector<2x4xf32>,
    return
  }
}

</mosaic_0001>

<bundles_post_ra>
// kernel: lstm_classifier_forward.1
= control target key start
LH: loop header
LB: loop body
LE: loop exit
PB: predicated region body
PF: predicated region fallthrough
CT: control target
= control target key end

     0   :  { %v2324_v1 = vmov 0.0   ;;  %vm2325_vm0 = vmmov 0   ;;  %vm75_vm1 = vcmask 130048   ;;  %s2807_s0 = inlined_call_operand.vmem [shape: bf16[16,16], index: 0, kind: input, shape index: {}]   ;;  %s2808_s1 = inlined_call_operand.vmem [shape: bf16[16,128], index: 1, kind: input, shape index: {}]   ;;  %s2809_s2 = inlined_call_operand.vmem [shape: bf16[32,128], index: 2, kind: input, shape index: {}]   ;;  %s2810_s3 = inlined_call_operand.vmem [shape: f32[1,128], index: 3, kind: input, shape index: {}]   ;;  %s2811_s4 = inlined_call_operand.vmem [shape: bf16[32,128], index: 4, kind: input, shape index: {}]   ;;  %s2812_s5 = inlined_call_operand.vmem [shape: bf16[32,128], index: 5, kind: input, shape index: {}]   ;;  %s2813_s6 = inlined_call_operand.vmem [shape: f32[1,128], index: 6, kind: input, shape index: {}]   ;;  %s2814_s7 = inlined_call_operand.vmem [shape: f32[32,64], index: 7, kind: input, shape index: {}]   ;;  %s2815_s8 = inlined_call_operand.vmem [shape: f32[1,64], index: 8, kind: input, shape index: {}]   ;;  %s2816_s9 = inlined_call_operand.vmem [shape: f32[64,4], index: 9, kind: input, shape index: {}]   ;;  %s2817_s10 = inlined_call_operand.vmem [shape: f32[1,4], index: 10, kind: input, shape index: {}]   ;;  %s2818_s11 = inlined_call_operand.hbm [shape: f32[2,4], index: 11, kind: output, shape index: {}]  }
   0x1   :  { %v2195_v0 = vld [vmem:[%s2808_s1] sm:$0xff]   ;;  %1961 = vmatprep.subr.bf16.mxu1 %v2324_v1  ;;  %1975 = vmatprep.subr.bf16.mxu0 %v2324_v1  ;;  %v2403_v3 = vld [vmem:[%s2809_s2 + $0x8] sm:$0xff]  }
   0x2   :  { %v2196_v2 = vld [vmem:[%s2807_s0] sm:$0xff]   ;;  %1962 = vmatpush3.bf16.msra.mxu1 %v2195_v0  ;;  %1963 = vmatprep.mubr.msk.bf16.mxu1 %vm2325_vm0, %v2324_v1 }
   0x3   :  { %1967 = vmatprep.subr.bf16.mxu1 %v2324_v1  ;;  %1979 = vmatprep.mubr.msk.bf16.mxu0 %vm2325_vm0, %v2324_v1  ;;  %v2411_v4 = vld [vmem:[%s2809_s2] sm:$0xff]  }
   0x5   :  { %1964 = vmatmul.mubr.msk.bf16.vlgmr.msra.gmra.mxu1 %vm75_vm1, %v2196_v2 }
   0x6   :  { %1968 = vmatpush3.bf16.msra.mxu1 %v2403_v3  ;;  %1971 = vmatprep.mubr.msk.bf16.mxu1 %vm2325_vm0, %v2324_v1 }
   0x7   :  { %1969 = vmatprep.subr.bf16.mxu1 %v2324_v1 }
   0x8   :  { %16 = vsyncpa [#allocation3], 0  ;;  %v2326_v5 = vmov 0   ;;  %v1836_v8 = vld [vmem:[%s2810_s3] ss:$0 sm:$0xff]  ;;  %s2327_s25 = smov 64  }
   0x9   :  { %s2328_s3 = smov 32   ;;  %v2437_v28 = vld [vmem:[%s2812_s5 + $0x8] sm:$0xff]   ;;  %v2448_v30 = vld [vmem:[%s2812_s5] sm:$0xff]   ;;  %vm132_vm2 = vcmask 261120   ;;  %vm1746_vm3 = vcmask 523264   ;;  %s2329_s20 = smov [#allocation2]  }
   0xa   :  { %1970 = vmatpush3.bf16.msra.mxu1 %v2411_v4  ;;  %v2442_v29 = vld [vmem:[%s2811_s4 + $0x8] sm:$0xff]   ;;  %1976 = vmatpush3.bf16.msra.mxu0 %v2437_v28  ;;  %v2454_v31 = vld [vmem:[%s2811_s4] sm:$0xff]   ;;  %s1828_s21 = sshll.u32 %s2329_s20, 4  ;;  %vm1820_vm4 = vcmask 25600   ;;  %s1829_s21 = int_to_ptr.vmem [resolvable:$true] %s1828_s21 }
   0xb   :  { %1983 = vmatprep.subr.bf16.mxu1 %v2324_v1  ;;  %1977 = vmatprep.subr.bf16.mxu0 %v2324_v1  ;;  %v2487_v41 = vld [vmem:[%s2813_s6] ss:$0 sm:$0xff]  ;;  %p2307_p1 = scmp.lt.s32.totalorder %s1829_s21, %s1829_s21 }
   0xd   :  { %1972 = vmatmul.mubr.bf16.vlgmr.msra.gmra.mxu1 %v2326_v5 }
   0xe   :  { %1987 = vmatprep.mubr.msk.bf16.mxu1 %vm2325_vm0, %v2324_v1  ;;  %1984 = vmatpush3.bf16.msra.mxu1 %v2442_v29 }
   0xf   :  { %1985 = vmatprep.subr.bf16.mxu1 %v2324_v1  ;;  %1978 = vmatpush3.bf16.msra.mxu0 %v2448_v30 }
  0x10   :  { %1991 = vmatprep.subr.bf16.mxu0 %v2324_v1 }
  0x12   :  { %1986 = vmatpush3.bf16.msra.mxu1 %v2454_v31  ;;  %1980 = vmatmul.mubr.bf16.vlgmr.msra.gmra.mxu0 %v2326_v5 }
  0x13   :  { %1999 = vmatprep.subr.bf16.mxu1 %v2324_v1  ;;  %1992 = vmatpush3.bf16.msra.mxu0 %v2403_v3 }
  0x14   :  { %1995 = vmatprep.mubr.msk.bf16.mxu0 %vm2325_vm0, %v2324_v1  ;;  %1993 = vmatprep.subr.bf16.mxu0 %v2324_v1 }
  0x17   :  { %1994 = vmatpush3.bf16.msra.mxu0 %v2411_v4 }
  0x18   :  { %2007 = vmatprep.subr.bf16.mxu0 %v2324_v1 }
  0xc5   :  { %v113_v6 = vpop.f32.mrf.mxu1 }
  0xc6   :  { %v2426_v12 = vadd.f32 %v1836_v8, %v113_v6 }
  0xc7   :  { %v1965_v7 = vpop.f32.mrf.mxu1 }
  0xc9   :  { %v116_v9 = vpop.f32.mrf.mxu1 }
  0xca   :  { %v2424_v10 = vadd.f32 %v1836_v8, %v116_v9 }
  0xcb   :  { %v1966_v11 = vpop.f32.mrf.mxu1 }
  0xcd   :  { %v170_v13 = vpop.f32.mrf.mxu1 }
  0xce   :  { %v176_v14 = vadd.f32 %v170_v13, %v2426_v12 }
  0xcf   :  { %v1973_v15 = vpop.f32.mrf.mxu1 }
  0xd0   :  { %2203 = vtanh.f32 %v176_v14  ;;  %v177_v19 = vmul.f32 0.5, %v176_v14 }
  0xd1   :  { %v173_v16 = vpop.f32.mrf.mxu1 }
  0xd2   :  { %2205 = vtanh.f32 %v177_v19  ;;  %v245_v36 = vpop.f32.mrf.mxu0 }
  0xd3   :  { %v1974_v17 = vpop.f32.mrf.mxu1 }
  0xd4   :  { %v1981_v37 = vpop.f32.mrf.mxu0 }
  0xd6   :  { %v248_v38 = vpop.f32.mrf.mxu0 }
  0xd8   :  { %v1982_v39 = vpop.f32.mrf.mxu0 }
  0xdd   :  { %v2204_v18 = vpop.eup %2203 }
  0xde   :  { %184 = vrot.lane.b32.xlu0 %v2204_v18, %s2327_s25 }
  0xdf   :  { %v2206_v20 = vpop.eup %2205 }
  0xe0   :  { %v179_v21 = vadd.f32 1.0, %v2206_v20 }
  0xe2   :  { %v180_v22 = vmul.f32 0.5, %v179_v21 }
  0xe4   :  { %v182_v25 = vmul.f32 0.0, %v180_v22 }
 0x150   :  { %v185_v23 = vpop.permute.xlu0 %184 }
 0x151   :  { %v187_v24 = vmul.f32 %v185_v23, %v180_v22 }
 0x153   :  { %189 = vrot.lane.b32.xlu0 %v187_v24, %s2328_s3 }
 0x1c5   :  { %v190_v26 = vpop.permute.xlu0 %189 }
 0x1c6   :  { %v2431_v27 = vadd.f32 %v190_v26, %v182_v25 }
 0x1c8   :  { %2207 = vtanh.f32 %v2431_v27  ;;  %v389_v7 = vrot.slane %v2431_v27, 6 }
 0x1d5   :  { %v2208_v32 = vpop.eup %2207 }
 0x1d6   :  { %195 = vrot.lane.b32.xlu1 %v2208_v32, %s2327_s25 }
 0x248   :  { %v196_v33 = vpop.permute.xlu1 %195 }
 0x249   :  { %v198_v34 = vmul.f32 %v196_v33, %v180_v22 }
 0x24b   :  { %v251_v35 = vpack.c.bf16 %v198_v34, %v198_v34 }
 0x24d   :  { %259 = vrot.lane.b32.xlu1 %v251_v35, %s2328_s3 }
 0x2bf   :  { %v260_v40 = vpop.permute.xlu1 %259 }
 0x2c0   :  { %1988 = vmatmul.mubr.msk.bf16.vlgmr.msra.gmra.mxu1 %vm132_vm2, %v260_v40  ;;  %1996 = vmatmul.mubr.msk.bf16.vlgmr.msra.gmra.mxu0 %vm132_vm2, %v260_v40 }
 0x2c1   :  { %2000 = vmatpush3.bf16.msra.mxu1 %v2437_v28  ;;  %2008 = vmatpush3.bf16.msra.mxu0 %v2442_v29 }
 0x2c2   :  { %2001 = vmatprep.subr.bf16.mxu1 %v2324_v1  ;;  %2009 = vmatprep.subr.bf16.mxu0 %v2324_v1 }
 0x2c3   :  { %2003 = vmatprep.mubr.msk.bf16.mxu1 %vm2325_vm0, %v2324_v1  ;;  %2011 = vmatprep.mubr.msk.bf16.mxu0 %vm2325_vm0, %v2324_v1 }
 0x2c5   :  { %2002 = vmatpush3.bf16.msra.mxu1 %v2448_v30  ;;  %2010 = vmatpush3.bf16.msra.mxu0 %v2454_v31 }
 0x2c6   :  { %2015 = vmatprep.subr.bf16.mxu1 %v2324_v1  ;;  %2023 = vmatprep.subr.bf16.mxu0 %v2324_v1 }
 0x380   :  { %v310_v42 = vpop.f32.mrf.mxu1  ;;  %v373_v43 = vpop.f32.mrf.mxu0 }
 0x381   :  { %v311_v44 = vadd.f32 %v2487_v41, %v310_v42  ;;  %v380_v45 = vrot.slane %v373_v43, 6 }
 0x382   :  { %v1989_v46 = vpop.f32.mrf.mxu1  ;;  %v1997_v47 = vpop.f32.mrf.mxu0 }
 0x383   :  { %v316_v48 = vadd.f32 %v311_v44, %v245_v36  ;;  %v382_v49 = vadd.f32 %v380_v45, %v2426_v12 }
 0x384   :  { %v313_v50 = vpop.f32.mrf.mxu1  ;;  %v376_v51 = vpop.f32.mrf.mxu0 }
 0x385   :  { %2209 = vtanh.f32 %v316_v48  ;;  %v317_v56 = vmul.f32 0.5, %v316_v48  ;;  %v383_v57 = vmul.f32 0.5, %v382_v49 }
 0x386   :  { %2211 = vtanh.f32 %v382_v49  ;;  %v1990_v52 = vpop.f32.mrf.mxu1  ;;  %v1998_v53 = vpop.f32.mrf.mxu0 }
 0x387   :  { %2213 = vtanh.f32 %v317_v56 }
 0x388   :  { %2215 = vtanh.f32 %v383_v57 }
 0x392   :  { %v2210_v54 = vpop.eup %2209 }
 0x393   :  { %v2212_v55 = vpop.eup %2211  ;;  %324 = vrot.lane.b32.xlu0 %v2210_v54, %s2327_s25 }
 0x394   :  { %393 = vrot.lane.b32.xlu1 %v2212_v55, %s2327_s25  ;;  %v2214_v58 = vpop.eup %2213 }
 0x395   :  { %v2216_v59 = vpop.eup %2215  ;;  %v319_v60 = vadd.f32 1.0, %v2214_v58 }
 0x396   :  { %v385_v61 = vadd.f32 1.0, %v2216_v59 }
 0x397   :  { %v320_v62 = vmul.f32 0.5, %v319_v60 }
 0x398   :  { %v386_v63 = vmul.f32 0.5, %v385_v61 }
 0x399   :  { %v322_v8 = vmul.f32 0.0, %v320_v62 }
 0x39a   :  { %v391_v9 = vmul.f32 %v389_v7, %v386_v63 }
 0x405   :  { %v325_v0 = vpop.permute.xlu0 %324 }
 0x406   :  { %v394_v2 = vpop.permute.xlu1 %393  ;;  %v327_v5 = vmul.f32 %v325_v0, %v320_v62 }
 0x407   :  { %v396_v6 = vmul.f32 %v394_v2, %v386_v63 }
 0x408   :  { %329 = vrot.lane.b32.xlu0 %v327_v5, %s2328_s3 }
 0x409   :  { %398 = vrot.lane.b32.xlu1 %v396_v6, %s2328_s3 }
 0x47a   :  { %v330_v11 = vpop.permute.xlu0 %329 }
 0x47b   :  { %v399_v13 = vpop.permute.xlu1 %398  ;;  %v2496_v14 = vadd.f32 %v330_v11, %v322_v8 }
 0x47c   :  { %v2498_v15 = vadd.f32 %v399_v13, %v391_v9 }
 0x47d   :  { %2217 = vtanh.f32 %v2496_v14 }
 0x47e   :  { %2219 = vtanh.f32 %v2498_v15  ;;  %v576_v2 = vrot.slane %v2498_v15, 6 }
 0x48a   :  { %v2218_v16 = vpop.eup %2217 }
 0x48b   :  { %v2220_v17 = vpop.eup %2219  ;;  %335 = vrot.lane.b32.xlu0 %v2218_v16, %s2327_s25 }
 0x48c   :  { %404 = vrot.lane.b32.xlu1 %v2220_v17, %s2327_s25 }
 0x4fd   :  { %v336_v18 = vpop.permute.xlu0 %335 }
 0x4fe   :  { %v405_v19 = vpop.permute.xlu1 %404  ;;  %v338_v20 = vmul.f32 %v336_v18, %v320_v62 }
 0x4ff   :  { %v407_v21 = vmul.f32 %v405_v19, %v386_v63 }
 0x500   :  { %v408_v22 = vpack.c.bf16 %v338_v20, %v338_v20 }
 0x501   :  { %v455_v23 = vpack.c.bf16 %v407_v21, %v407_v21 }
 0x502   :  { %410 = vrot.lane.b32.xlu0 %v408_v22, %s2328_s3 }
 0x503   :  { %v457_v24 = vrot.slane %v455_v23, 1 }
 0x505   :  { %458 = vrot.lane.b32.xlu1 %v457_v24, %s2328_s3 }
 0x574   :  { %v411_v25 = vpop.permute.xlu0 %410 }
 0x575   :  { %2004 = vmatmul.mubr.msk.bf16.vlgmr.msra.gmra.mxu1 %vm132_vm2, %v411_v25 }
 0x576   :  { %2016 = vmatpush3.bf16.msra.mxu1 %v2403_v3  ;;  %2019 = vmatprep.mubr.msk.bf16.mxu1 %vm2325_vm0, %v2324_v1 }
 0x577   :  { %v459_v26 = vpop.permute.xlu1 %458  ;;  %2017 = vmatprep.subr.bf16.mxu1 %v2324_v1 }
 0x578   :  { %2012 = vmatmul.mubr.msk.bf16.vlgmr.msra.gmra.mxu0 %vm132_vm2, %v459_v26 }
 0x579   :  { %2024 = vmatpush3.bf16.msra.mxu0 %v2437_v28  ;;  %2027 = vmatprep.mubr.msk.bf16.mxu0 %vm2325_vm0, %v2324_v1 }
 0x57a   :  { %2018 = vmatpush3.bf16.msra.mxu1 %v2411_v4  ;;  %2025 = vmatprep.subr.bf16.mxu0 %v2324_v1 }
 0x57b   :  { %2031 = vmatprep.subr.bf16.mxu1 %v2324_v1 }
 0x57d   :  { %2020 = vmatmul.mubr.msk.bf16.vlgmr.msra.gmra.mxu1 %vm132_vm2, %v459_v26  ;;  %2026 = vmatpush3.bf16.msra.mxu0 %v2448_v30 }
 0x57e   :  { %2039 = vmatprep.subr.bf16.mxu0 %v2324_v1  ;;  %2032 = vmatpush3.bf16.msra.mxu1 %v2442_v29 }
 0x57f   :  { %2033 = vmatprep.subr.bf16.mxu1 %v2324_v1  ;;  %2035 = vmatprep.mubr.msk.bf16.mxu1 %vm2325_vm0, %v2324_v1 }
 0x582   :  { %2034 = vmatpush3.bf16.msra.mxu1 %v2454_v31 }
 0x583   :  { %2047 = vmatprep.subr.bf16.mxu1 %v2324_v1 }
 0x635   :  { %v449_v27 = vpop.f32.mrf.mxu1 }
 0x637   :  { %v2005_v32 = vpop.f32.mrf.mxu1 }
 0x638   :  { %v497_v33 = vpop.f32.mrf.mxu0 }
 0x639   :  { %v498_v34 = vadd.f32 %v2487_v41, %v497_v33  ;;  %v452_v35 = vpop.f32.mrf.mxu1 }
 0x63a   :  { %v2013_v36 = vpop.f32.mrf.mxu0 }
 0x63b   :  { %v503_v37 = vadd.f32 %v498_v34, %v449_v27  ;;  %v2006_v38 = vpop.f32.mrf.mxu1 }
 0x63c   :  { %v500_v39 = vpop.f32.mrf.mxu0 }
 0x63d   :  { %2221 = vtanh.f32 %v503_v37  ;;  %v560_v40 = vpop.f32.mrf.mxu1  ;;  %v504_v50 = vmul.f32 0.5, %v503_v37 }
 0x63e   :  { %v2014_v42 = vpop.f32.mrf.mxu0  ;;  %v567_v43 = vrot.slane %v560_v40, 4 }
 0x63f   :  { %v2021_v44 = vpop.f32.mrf.mxu1 }
 0x640   :  { %v569_v45 = vadd.f32 %v567_v43, %v2426_v12 }
 0x641   :  { %v563_v46 = vpop.f32.mrf.mxu1 }
 0x642   :  { %2223 = vtanh.f32 %v569_v45  ;;  %v570_v51 = vmul.f32 0.5, %v569_v45 }
 0x643   :  { %v2022_v47 = vpop.f32.mrf.mxu1  ;;  %2225 = vtanh.f32 %v504_v50 }
 0x644   :  { %2227 = vtanh.f32 %v570_v51 }
 0x64a   :  { %v2222_v48 = vpop.eup %2221 }
 0x64b   :  { %511 = vrot.lane.b32.xlu0 %v2222_v48, %s2327_s25 }
 0x64f   :  { %v2224_v49 = vpop.eup %2223 }
 0x650   :  { %580 = vrot.lane.b32.xlu1 %v2224_v49, %s2327_s25  ;;  %v2226_v52 = vpop.eup %2225 }
 0x651   :  { %v506_v53 = vadd.f32 1.0, %v2226_v52  ;;  %v2228_v54 = vpop.eup %2227 }
 0x652   :  { %v572_v57 = vadd.f32 1.0, %v2228_v54 }
 0x653   :  { %v507_v55 = vmul.f32 0.5, %v506_v53 }
 0x654   :  { %v573_v59 = vmul.f32 0.5, %v572_v57 }
 0x655   :  { %v509_v62 = vmul.f32 %v507_v55, %v2496_v14 }
 0x656   :  { %v578_v5 = vmul.f32 %v576_v2, %v573_v59 }
 0x6bd   :  { %v512_v56 = vpop.permute.xlu0 %511 }
 0x6be   :  { %v514_v58 = vmul.f32 %v512_v56, %v507_v55 }
 0x6c0   :  { %516 = vrot.lane.b32.xlu0 %v514_v58, %s2328_s3 }
 0x6c2   :  { %v581_v60 = vpop.permute.xlu1 %580 }
 0x6c3   :  { %v583_v61 = vmul.f32 %v581_v60, %v573_v59 }
 0x6c5   :  { %585 = vrot.lane.b32.xlu1 %v583_v61, %s2328_s3 }
 0x732   :  { %v517_v63 = vpop.permute.xlu0 %516 }
 0x733   :  { %v2534_v0 = vadd.f32 %v517_v63, %v509_v62 }
 0x735   :  { %2229 = vtanh.f32 %v2534_v0 }
 0x737   :  { %v586_v6 = vpop.permute.xlu1 %585 }
 0x738   :  { %v2538_v7 = vadd.f32 %v586_v6, %v578_v5 }
 0x73a   :  { %2231 = vtanh.f32 %v2538_v7 }
 0x742   :  { %v2230_v8 = vpop.eup %2229 }
 0x743   :  { %522 = vrot.lane.b32.xlu0 %v2230_v8, %s2327_s25 }
 0x747   :  { %v2232_v9 = vpop.eup %2231 }
 0x748   :  { %591 = vrot.lane.b32.xlu1 %v2232_v9, %s2327_s25 }
 0x7b5   :  { %v523_v11 = vpop.permute.xlu0 %522 }
 0x7b6   :  { %v525_v13 = vmul.f32 %v523_v11, %v507_v55  ;;  %v763_v55 = vrot.slane %v2538_v7, 6 }
 0x7b8   :  { %v595_v14 = vpack.c.bf16 %v525_v13, %v525_v13 }
 0x7ba   :  { %597 = vrot.lane.b32.xlu0 %v595_v14, %s2328_s3  ;;  %v592_v15 = vpop.permute.xlu1 %591 }
 0x7bb   :  { %v594_v16 = vmul.f32 %v592_v15, %v573_v59 }
 0x7bd   :  { %v642_v17 = vpack.c.bf16 %v594_v16, %v594_v16 }
 0x7bf   :  { %v644_v18 = vrot.slane %v642_v17, 2 }
 0x7c1   :  { %645 = vrot.lane.b32.xlu1 %v644_v18, %s2328_s3 }
 0x82c   :  { %v598_v19 = vpop.permute.xlu0 %597 }
 0x82d   :  { %2028 = vmatmul.mubr.msk.bf16.vlgmr.msra.gmra.mxu0 %vm132_vm2, %v598_v19 }
 0x82e   :  { %2040 = vmatpush3.bf16.msra.mxu0 %v2403_v3  ;;  %2043 = vmatprep.mubr.msk.bf16.mxu0 %vm2325_vm0, %v2324_v1 }
 0x82f   :  { %2041 = vmatprep.subr.bf16.mxu0 %v2324_v1 }
 0x832   :  { %2042 = vmatpush3.bf16.msra.mxu0 %v2411_v4 }
 0x833   :  { %v646_v20 = vpop.permute.xlu1 %645  ;;  %2055 = vmatprep.subr.bf16.mxu0 %v2324_v1 }
 0x834   :  { %2036 = vmatmul.mubr.msk.bf16.vlgmr.msra.gmra.mxu1 %vm132_vm2, %v646_v20 }
 0x835   :  { %2044 = vmatmul.mubr.msk.bf16.vlgmr.msra.gmra.mxu0 %vm132_vm2, %v646_v20  ;;  %2048 = vmatpush3.bf16.msra.mxu1 %v2437_v28 }
 0x836   :  { %2056 = vmatpush3.bf16.msra.mxu0 %v2442_v29  ;;  %2049 = vmatprep.subr.bf16.mxu1 %v2324_v1 }
 0x837   :  { %2057 = vmatprep.subr.bf16.mxu0 %v2324_v1  ;;  %2051 = vmatprep.mubr.msk.bf16.mxu1 %vm2325_vm0, %v2324_v1 }
 0x838   :  { %2059 = vmatprep.mubr.msk.bf16.mxu0 %vm2325_vm0, %v2324_v1 }
 0x839   :  { %2050 = vmatpush3.bf16.msra.mxu1 %v2448_v30 }
 0x83a   :  { %2058 = vmatpush3.bf16.msra.mxu0 %v2454_v31  ;;  %2063 = vmatprep.subr.bf16.mxu1 %v2324_v1 }
 0x83b   :  { %2071 = vmatprep.subr.bf16.mxu0 %v2324_v1 }
 0x8ed   :  { %v636_v21 = vpop.f32.mrf.mxu0 }
 0x8ef   :  { %v2029_v22 = vpop.f32.mrf.mxu0 }
 0x8f1   :  { %v639_v23 = vpop.f32.mrf.mxu0 }
 0x8f3   :  { %v2030_v24 = vpop.f32.mrf.mxu0 }
 0x8f4   :  { %v684_v25 = vpop.f32.mrf.mxu1 }
 0x8f5   :  { %v685_v26 = vadd.f32 %v2487_v41, %v684_v25  ;;  %v747_v27 = vpop.f32.mrf.mxu0 }
 0x8f6   :  { %v754_v32 = vrot.slane %v747_v27, 2  ;;  %v2037_v33 = vpop.f32.mrf.mxu1 }
 0x8f7   :  { %v690_v34 = vadd.f32 %v685_v26, %v636_v21  ;;  %v2045_v35 = vpop.f32.mrf.mxu0 }
 0x8f8   :  { %v756_v36 = vadd.f32 %v754_v32, %v2426_v12  ;;  %v687_v37 = vpop.f32.mrf.mxu1 }
 0x8f9   :  { %2233 = vtanh.f32 %v690_v34  ;;  %v750_v38 = vpop.f32.mrf.mxu0  ;;  %v691_v44 = vmul.f32 0.5, %v690_v34 }
 0x8fa   :  { %2235 = vtanh.f32 %v756_v36  ;;  %v2038_v39 = vpop.f32.mrf.mxu1  ;;  %v757_v45 = vmul.f32 0.5, %v756_v36 }
 0x8fb   :  { %v2046_v40 = vpop.f32.mrf.mxu0  ;;  %2237 = vtanh.f32 %v691_v44 }
 0x8fc   :  { %2239 = vtanh.f32 %v757_v45 }
 0x906   :  { %v2234_v42 = vpop.eup %2233 }
 0x907   :  { %v2236_v43 = vpop.eup %2235  ;;  %698 = vrot.lane.b32.xlu1 %v2234_v42, %s2327_s25 }
 0x908   :  { %767 = vrot.lane.b32.xlu0 %v2236_v43, %s2327_s25  ;;  %v2238_v46 = vpop.eup %2237 }
 0x909   :  { %v2240_v47 = vpop.eup %2239  ;;  %v693_v48 = vadd.f32 1.0, %v2238_v46 }
 0x90a   :  { %v759_v12 = vadd.f32 1.0, %v2240_v47 }
 0x90b   :  { %v694_v49 = vmul.f32 0.5, %v693_v48 }
 0x90c   :  { %v760_v50 = vmul.f32 0.5, %v759_v12 }
 0x90d   :  { %v696_v56 = vmul.f32 %v694_v49, %v2534_v0 }
 0x90e   :  { %v765_v57 = vmul.f32 %v763_v55, %v760_v50 }
 0x979   :  { %v699_v51 = vpop.permute.xlu1 %698 }
 0x97a   :  { %v768_v52 = vpop.permute.xlu0 %767  ;;  %v701_v53 = vmul.f32 %v699_v51, %v694_v49 }
 0x97b   :  { %v770_v54 = vmul.f32 %v768_v52, %v760_v50 }
 0x97c   :  { %703 = vrot.lane.b32.xlu1 %v701_v53, %s2328_s3 }
 0x97d   :  { %772 = vrot.lane.b32.xlu0 %v770_v54, %s2328_s3 }
 0x9ee   :  { %v704_v58 = vpop.permute.xlu1 %703 }
 0x9ef   :  { %v773_v59 = vpop.permute.xlu0 %772  ;;  %v2574_v60 = vadd.f32 %v704_v58, %v696_v56 }
 0x9f0   :  { %v2576_v61 = vadd.f32 %v773_v59, %v765_v57 }
 0x9f1   :  { %2241 = vtanh.f32 %v2574_v60 }
 0x9f2   :  { %2243 = vtanh.f32 %v2576_v61  ;;  %v947_v12 = vrot.slane %v2576_v61, 6 }
 0x9fe   :  { %v2242_v62 = vpop.eup %2241 }
 0x9ff   :  { %v2244_v63 = vpop.eup %2243  ;;  %709 = vrot.lane.b32.xlu1 %v2242_v62, %s2327_s25 }
 0xa00   :  { %778 = vrot.lane.b32.xlu0 %v2244_v63, %s2327_s25 }
 0xa71   :  { %v710_v2 = vpop.permute.xlu1 %709 }
 0xa72   :  { %v779_v5 = vpop.permute.xlu0 %778  ;;  %v712_v0 = vmul.f32 %v710_v2, %v694_v49 }
 0xa73   :  { %v781_v6 = vmul.f32 %v779_v5, %v760_v50 }
 0xa74   :  { %v782_v7 = vpack.c.bf16 %v712_v0, %v712_v0 }
 0xa75   :  { %v829_v8 = vpack.c.bf16 %v781_v6, %v781_v6 }
 0xa76   :  { %784 = vrot.lane.b32.xlu1 %v782_v7, %s2328_s3 }
 0xa77   :  { %v831_v9 = vrot.slane %v829_v8, 3 }
 0xa79   :  { %832 = vrot.lane.b32.xlu0 %v831_v9, %s2328_s3 }
 0xae8   :  { %v785_v11 = vpop.permute.xlu1 %784 }
 0xae9   :  { %2052 = vmatmul.mubr.msk.bf16.vlgmr.msra.gmra.mxu1 %vm132_vm2, %v785_v11 }
 0xaea   :  { %2064 = vmatpush3.bf16.msra.mxu1 %v2403_v3  ;;  %2067 = vmatprep.mubr.msk.bf16.mxu1 %vm2325_vm0, %v2324_v1 }
 0xaeb   :  { %v833_v13 = vpop.permute.xlu0 %832  ;;  %2065 = vmatprep.subr.bf16.mxu1 %v2324_v1 }
 0xaec   :  { %2060 = vmatmul.mubr.msk.bf16.vlgmr.msra.gmra.mxu0 %vm132_vm2, %v833_v13 }
 0xaed   :  { %2072 = vmatpush3.bf16.msra.mxu0 %v2437_v28  ;;  %2075 = vmatprep.mubr.msk.bf16.mxu0 %vm2325_vm0, %v2324_v1 }
 0xaee   :  { %2066 = vmatpush3.bf16.msra.mxu1 %v2411_v4  ;;  %2073 = vmatprep.subr.bf16.mxu0 %v2324_v1 }
 0xaef   :  { %2079 = vmatprep.subr.bf16.mxu1 %v2324_v1 }
 0xaf1   :  { %2068 = vmatmul.mubr.msk.bf16.vlgmr.msra.gmra.mxu1 %vm132_vm2, %v833_v13  ;;  %2074 = vmatpush3.bf16.msra.mxu0 %v2448_v30 }
 0xaf2   :  { %2080 = vmatpush3.bf16.msra.mxu1 %v2442_v29  ;;  %2087 = vmatprep.subr.bf16.mxu0 %v2324_v1 }
 0xaf3   :  { %2081 = vmatprep.subr.bf16.mxu1 %v2324_v1  ;;  %2083 = vmatprep.mubr.msk.bf16.mxu1 %vm2325_vm0, %v2324_v1 }
 0xaf6   :  { %2082 = vmatpush3.bf16.msra.mxu1 %v2454_v31 }
 0xaf7   :  { %2095 = vmatprep.subr.bf16.mxu1 %v2324_v1 }
 0xba9   :  { %v823_v14 = vpop.f32.mrf.mxu1 }
 0xbab   :  { %v2053_v15 = vpop.f32.mrf.mxu1 }
 0xbac   :  { %v871_v16 = vpop.f32.mrf.mxu0 }
 0xbad   :  { %v872_v17 = vadd.f32 %v2487_v41, %v871_v16  ;;  %v826_v18 = vpop.f32.mrf.mxu1 }
 0xbae   :  { %v2061_v19 = vpop.f32.mrf.mxu0 }
 0xbaf   :  { %v877_v20 = vadd.f32 %v872_v17, %v823_v14  ;;  %v2054_v21 = vpop.f32.mrf.mxu1 }
 0xbb0   :  { %v874_v22 = vpop.f32.mrf.mxu0 }
 0xbb1   :  { %2245 = vtanh.f32 %v877_v20  ;;  %v934_v23 = vpop.f32.mrf.mxu1  ;;  %v878_v35 = vmul.f32 0.5, %v877_v20 }
 0xbb2   :  { %v2062_v24 = vpop.f32.mrf.mxu0  ;;  %v940_v25 = vadd.f32 %v934_v23, %v2424_v10 }
 0xbb3   :  { %v2069_v26 = vpop.f32.mrf.mxu1 }
 0xbb4   :  { %2247 = vtanh.f32 %v940_v25  ;;  %v941_v36 = vmul.f32 0.5, %v940_v25 }
 0xbb5   :  { %v937_v27 = vpop.f32.mrf.mxu1  ;;  %2249 = vtanh.f32 %v878_v35 }
 0xbb6   :  { %2251 = vtanh.f32 %v941_v36 }
 0xbb7   :  { %v2070_v32 = vpop.f32.mrf.mxu1 }
 0xbbe   :  { %v2246_v33 = vpop.eup %2245 }
 0xbbf   :  { %885 = vrot.lane.b32.xlu0 %v2246_v33, %s2327_s25 }
 0xbc1   :  { %v2248_v34 = vpop.eup %2247 }
 0xbc2   :  { %951 = vrot.lane.b32.xlu1 %v2248_v34, %s2327_s25  ;;  %v2250_v37 = vpop.eup %2249 }
 0xbc3   :  { %v2252_v38 = vpop.eup %2251  ;;  %v880_v39 = vadd.f32 1.0, %v2250_v37 }
 0xbc4   :  { %v943_v40 = vadd.f32 1.0, %v2252_v38 }
 0xbc5   :  { %v881_v42 = vmul.f32 0.5, %v880_v39 }
 0xbc6   :  { %v944_v45 = vmul.f32 0.5, %v943_v40 }
 0xbc7   :  { %v883_v48 = vmul.f32 %v881_v42, %v2574_v60 }
 0xbc8   :  { %v949_v51 = vmul.f32 %v947_v12, %v944_v45 }
 0xc31   :  { %v886_v43 = vpop.permute.xlu0 %885 }
 0xc32   :  { %v888_v44 = vmul.f32 %v886_v43, %v881_v42 }
 0xc34   :  { %890 = vrot.lane.b32.xlu0 %v888_v44, %s2328_s3  ;;  %v952_v46 = vpop.permute.xlu1 %951 }
 0xc35   :  { %v954_v47 = vmul.f32 %v952_v46, %v944_v45 }
 0xc37   :  { %956 = vrot.lane.b32.xlu1 %v954_v47, %s2328_s3 }
 0xca6   :  { %v891_v49 = vpop.permute.xlu0 %890 }
 0xca7   :  { %v2613_v50 = vadd.f32 %v891_v49, %v883_v48 }
 0xca9   :  { %2253 = vtanh.f32 %v2613_v50  ;;  %v957_v52 = vpop.permute.xlu1 %956 }
 0xcaa   :  { %v2616_v53 = vadd.f32 %v957_v52, %v949_v51 }
 0xcac   :  { %2255 = vtanh.f32 %v2616_v53  ;;  %v1133_v43 = vrot.slane %v2616_v53, 6 }
 0xcb6   :  { %v2254_v54 = vpop.eup %2253 }
 0xcb7   :  { %896 = vrot.lane.b32.xlu0 %v2254_v54, %s2327_s25 }
 0xcb9   :  { %v2256_v55 = vpop.eup %2255 }
 0xcba   :  { %962 = vrot.lane.b32.xlu1 %v2256_v55, %s2327_s25 }
 0xd29   :  { %v897_v56 = vpop.permute.xlu0 %896 }
 0xd2a   :  { %v899_v57 = vmul.f32 %v897_v56, %v881_v42 }
 0xd2c   :  { %v966_v58 = vpack.c.bf16 %v899_v57, %v899_v57  ;;  %v963_v59 = vpop.permute.xlu1 %962 }
 0xd2d   :  { %v965_v60 = vmul.f32 %v963_v59, %v944_v45 }
 0xd2e   :  { %968 = vrot.lane.b32.xlu0 %v966_v58, %s2328_s3 }
 0xd2f   :  { %v1013_v61 = vpack.c.bf16 %v965_v60, %v965_v60 }
 0xd31   :  { %1015 = vrot.lane.b32.xlu1 %v1013_v61, %s2328_s3 }
 0xda0   :  { %v969_v62 = vpop.permute.xlu0 %968 }
 0xda1   :  { %2076 = vmatmul.mubr.msk.bf16.vlgmr.msra.gmra.mxu0 %vm132_vm2, %v969_v62 }
 0xda2   :  { %2088 = vmatpush3.bf16.msra.mxu0 %v2403_v3  ;;  %2091 = vmatprep.mubr.msk.bf16.mxu0 %vm2325_vm0, %v2324_v1 }
 0xda3   :  { %v1016_v63 = vpop.permute.xlu1 %1015  ;;  %2089 = vmatprep.subr.bf16.mxu0 %v2324_v1 }
 0xda4   :  { %2084 = vmatmul.mubr.msk.bf16.vlgmr.msra.gmra.mxu1 %vm132_vm2, %v1016_v63 }
 0xda5   :  { %2096 = vmatpush3.bf16.msra.mxu1 %v2437_v28  ;;  %2099 = vmatprep.mubr.msk.bf16.mxu1 %vm2325_vm0, %v2324_v1 }
 0xda6   :  { %2090 = vmatpush3.bf16.msra.mxu0 %v2411_v4  ;;  %2097 = vmatprep.subr.bf16.mxu1 %v2324_v1 }
 0xda7   :  { %2103 = vmatprep.subr.bf16.mxu0 %v2324_v1 }
 0xda9   :  { %2092 = vmatmul.mubr.msk.bf16.vlgmr.msra.gmra.mxu0 %vm132_vm2, %v1016_v63  ;;  %2098 = vmatpush3.bf16.msra.mxu1 %v2448_v30 }
 0xdaa   :  { %2104 = vmatpush3.bf16.msra.mxu0 %v2442_v29  ;;  %2111 = vmatprep.subr.bf16.mxu1 %v2324_v1 }
 0xdab   :  { %2105 = vmatprep.subr.bf16.mxu0 %v2324_v1  ;;  %2107 = vmatprep.mubr.msk.bf16.mxu0 %vm2325_vm0, %v2324_v1 }
 0xdae   :  { %2106 = vmatpush3.bf16.msra.mxu0 %v2454_v31 }
 0xdaf   :  { %2119 = vmatprep.subr.bf16.mxu0 %v2324_v1 }
 0xe61   :  { %v1007_v2 = vpop.f32.mrf.mxu0 }
 0xe63   :  { %v2077_v5 = vpop.f32.mrf.mxu0 }
 0xe64   :  { %v1054_v0 = vpop.f32.mrf.mxu1 }
 0xe65   :  { %v1010_v6 = vpop.f32.mrf.mxu0  ;;  %v1055_v7 = vadd.f32 %v2487_v41, %v1054_v0 }
 0xe66   :  { %v2085_v8 = vpop.f32.mrf.mxu1 }
 0xe67   :  { %v1060_v9 = vadd.f32 %v1055_v7, %v1007_v2  ;;  %v2078_v11 = vpop.f32.mrf.mxu0 }
 0xe68   :  { %v1057_v13 = vpop.f32.mrf.mxu1 }
 0xe69   :  { %2257 = vtanh.f32 %v1060_v9  ;;  %v1117_v14 = vpop.f32.mrf.mxu0  ;;  %v1061_v23 = vmul.f32 0.5, %v1060_v9 }
 0xe6a   :  { %v1124_v15 = vrot.slane %v1117_v14, 6  ;;  %v2086_v16 = vpop.f32.mrf.mxu1 }
 0xe6b   :  { %v2093_v17 = vpop.f32.mrf.mxu0 }
 0xe6c   :  { %v1126_v18 = vadd.f32 %v1124_v15, %v2424_v10 }
 0xe6d   :  { %v1120_v19 = vpop.f32.mrf.mxu0 }
 0xe6e   :  { %2259 = vtanh.f32 %v1126_v18  ;;  %v1127_v24 = vmul.f32 0.5, %v1126_v18 }
 0xe6f   :  { %v2094_v20 = vpop.f32.mrf.mxu0  ;;  %2261 = vtanh.f32 %v1061_v23 }
 0xe70   :  { %2263 = vtanh.f32 %v1127_v24 }
 0xe76   :  { %v2258_v21 = vpop.eup %2257 }
 0xe77   :  { %1068 = vrot.lane.b32.xlu0 %v2258_v21, %s2327_s25 }
 0xe7b   :  { %v2260_v22 = vpop.eup %2259 }
 0xe7c   :  { %1137 = vrot.lane.b32.xlu1 %v2260_v22, %s2327_s25  ;;  %v2262_v25 = vpop.eup %2261 }
 0xe7d   :  { %v1063_v26 = vadd.f32 1.0, %v2262_v25  ;;  %v2264_v27 = vpop.eup %2263 }
 0xe7e   :  { %v1129_v34 = vadd.f32 1.0, %v2264_v27 }
 0xe7f   :  { %v1064_v32 = vmul.f32 0.5, %v1063_v26 }
 0xe80   :  { %v1130_v36 = vmul.f32 0.5, %v1129_v34 }
 0xe81   :  { %v1066_v39 = vmul.f32 %v1064_v32, %v2613_v50 }
 0xe82   :  { %v1135_v44 = vmul.f32 %v1133_v43, %v1130_v36 }
 0xee9   :  { %v1069_v33 = vpop.permute.xlu0 %1068 }
 0xeea   :  { %v1071_v35 = vmul.f32 %v1069_v33, %v1064_v32 }
 0xeec   :  { %1073 = vrot.lane.b32.xlu0 %v1071_v35, %s2328_s3 }
 0xeee   :  { %v1138_v37 = vpop.permute.xlu1 %1137 }
 0xeef   :  { %v1140_v38 = vmul.f32 %v1138_v37, %v1130_v36 }
 0xef1   :  { %1142 = vrot.lane.b32.xlu1 %v1140_v38, %s2328_s3 }
 0xf5e   :  { %v1074_v40 = vpop.permute.xlu0 %1073 }
 0xf5f   :  { %v2651_v42 = vadd.f32 %v1074_v40, %v1066_v39 }
 0xf61   :  { %2265 = vtanh.f32 %v2651_v42 }
 0xf63   :  { %v1143_v45 = vpop.permute.xlu1 %1142 }
 0xf64   :  { %v2655_v46 = vadd.f32 %v1143_v45, %v1135_v44 }
 0xf66   :  { %2267 = vtanh.f32 %v2655_v46  ;;  %v1320_v26 = vrot.slane %v2655_v46, 6 }
 0xf6e   :  { %v2266_v47 = vpop.eup %2265 }
 0xf6f   :  { %1079 = vrot.lane.b32.xlu0 %v2266_v47, %s2327_s25 }
 0xf73   :  { %v2268_v48 = vpop.eup %2267 }
 0xf74   :  { %1148 = vrot.lane.b32.xlu1 %v2268_v48, %s2327_s25  ;;  %v2299_v48 = vld [vmem:[%s2809_s2 + $0x8] sm:$0xff]  }
 0xfe1   :  { %v1080_v12 = vpop.permute.xlu0 %1079 }
 0xfe2   :  { %v1082_v49 = vmul.f32 %v1080_v12, %v1064_v32 }
 0xfe4   :  { %v1152_v50 = vpack.c.bf16 %v1082_v49, %v1082_v49  ;;  %v2300_v49 = vld [vmem:[%s2809_s2] sm:$0xff]  }
 0xfe6   :  { %v1149_v51 = vpop.permute.xlu1 %1148  ;;  %1154 = vrot.lane.b32.xlu0 %v1152_v50, %s2328_s3 }
 0xfe7   :  { %v1151_v52 = vmul.f32 %v1149_v51, %v1130_v36 }
 0xfe9   :  { %v1199_v53 = vpack.c.bf16 %v1151_v52, %v1151_v52 }
 0xfeb   :  { %v1201_v54 = vrot.slane %v1199_v53, 1 }
 0xfed   :  { %1202 = vrot.lane.b32.xlu1 %v1201_v54, %s2328_s3 }
0x1058   :  { %v1155_v55 = vpop.permute.xlu0 %1154 }
0x1059   :  { %2100 = vmatmul.mubr.msk.bf16.vlgmr.msra.gmra.mxu1 %vm132_vm2, %v1155_v55 }
0x105a   :  { %2112 = vmatpush3.bf16.msra.mxu1 %v2403_v3  ;;  %2115 = vmatprep.mubr.msk.bf16.mxu1 %vm2325_vm0, %v2324_v1 }
0x105b   :  { %2113 = vmatprep.subr.bf16.mxu1 %v2324_v1 }
0x105e   :  { %2114 = vmatpush3.bf16.msra.mxu1 %v2411_v4 }
0x105f   :  { %v1203_v56 = vpop.permute.xlu1 %1202  ;;  %2127 = vmatprep.subr.bf16.mxu1 %v2324_v1 }
0x1060   :  { %2108 = vmatmul.mubr.msk.bf16.vlgmr.msra.gmra.mxu0 %vm132_vm2, %v1203_v56 }
0x1061   :  { %2116 = vmatmul.mubr.msk.bf16.vlgmr.msra.gmra.mxu1 %vm132_vm2, %v1203_v56  ;;  %2120 = vmatpush3.bf16.msra.mxu0 %v2437_v28 }
0x1062   :  { %2121 = vmatprep.subr.bf16.mxu0 %v2324_v1  ;;  %2128 = vmatpush3.bf16.msra.mxu1 %v2442_v29 }
0x1063   :  { %2123 = vmatprep.mubr.msk.bf16.mxu0 %vm2325_vm0, %v2324_v1  ;;  %2129 = vmatprep.subr.bf16.mxu1 %v2324_v1 }
0x1064   :  { %2131 = vmatprep.mubr.msk.bf16.mxu1 %vm2325_vm0, %v2324_v1 }
0x1065   :  { %2122 = vmatpush3.bf16.msra.mxu0 %v2448_v30 }
0x1066   :  { %2135 = vmatprep.subr.bf16.mxu0 %v2324_v1  ;;  %2130 = vmatpush3.bf16.msra.mxu1 %v2454_v31 }
0x1067   :  { %2143 = vmatprep.subr.bf16.mxu1 %v2324_v1 }
0x1119   :  { %v1193_v3 = vpop.f32.mrf.mxu1 }
0x111b   :  { %v2101_v4 = vpop.f32.mrf.mxu1 }
0x111d   :  { %v1196_v57 = vpop.f32.mrf.mxu1 }
0x111f   :  { %v2102_v58 = vpop.f32.mrf.mxu1 }
0x1120   :  { %v1241_v59 = vpop.f32.mrf.mxu0 }
0x1121   :  { %v1242_v60 = vadd.f32 %v2487_v41, %v1241_v59  ;;  %v1304_v61 = vpop.f32.mrf.mxu1 }
0x1122   :  { %v2109_v62 = vpop.f32.mrf.mxu0  ;;  %v1311_v63 = vrot.slane %v1304_v61, 4 }
0x1123   :  { %v1247_v2 = vadd.f32 %v1242_v60, %v1193_v3  ;;  %v2117_v5 = vpop.f32.mrf.mxu1 }
0x1124   :  { %v1313_v0 = vadd.f32 %v1311_v63, %v2424_v10  ;;  %v1244_v6 = vpop.f32.mrf.mxu0 }
0x1125   :  { %2269 = vtanh.f32 %v1247_v2  ;;  %v1307_v7 = vpop.f32.mrf.mxu1  ;;  %v1248_v14 = vmul.f32 0.5, %v1247_v2 }
0x1126   :  { %2271 = vtanh.f32 %v1313_v0  ;;  %v2110_v8 = vpop.f32.mrf.mxu0  ;;  %v1314_v15 = vmul.f32 0.5, %v1313_v0 }
0x1127   :  { %v2118_v9 = vpop.f32.mrf.mxu1  ;;  %2273 = vtanh.f32 %v1248_v14 }
0x1128   :  { %2275 = vtanh.f32 %v1314_v15 }
0x1132   :  { %v2270_v11 = vpop.eup %2269 }
0x1133   :  { %v2272_v13 = vpop.eup %2271  ;;  %1255 = vrot.lane.b32.xlu0 %v2270_v11, %s2327_s25 }
0x1134   :  { %1324 = vrot.lane.b32.xlu1 %v2272_v13, %s2327_s25  ;;  %v2274_v16 = vpop.eup %2273 }
0x1135   :  { %v2276_v17 = vpop.eup %2275  ;;  %v1250_v18 = vadd.f32 1.0, %v2274_v16 }
0x1136   :  { %v1316_v19 = vadd.f32 1.0, %v2276_v17 }
0x1137   :  { %v1251_v20 = vmul.f32 0.5, %v1250_v18 }
0x1138   :  { %v1317_v22 = vmul.f32 0.5, %v1316_v19 }
0x1139   :  { %v1253_v27 = vmul.f32 %v1251_v20, %v2651_v42 }
0x113a   :  { %v1322_v33 = vmul.f32 %v1320_v26, %v1317_v22 }
0x11a5   :  { %v1256_v21 = vpop.permute.xlu0 %1255 }
0x11a6   :  { %v1258_v23 = vmul.f32 %v1256_v21, %v1251_v20  ;;  %v1325_v24 = vpop.permute.xlu1 %1324 }
0x11a7   :  { %v1327_v25 = vmul.f32 %v1325_v24, %v1317_v22 }
0x11a8   :  { %1260 = vrot.lane.b32.xlu0 %v1258_v23, %s2328_s3 }
0x11a9   :  { %1329 = vrot.lane.b32.xlu1 %v1327_v25, %s2328_s3 }
0x121a   :  { %v1261_v32 = vpop.permute.xlu0 %1260 }
0x121b   :  { %v2691_v34 = vadd.f32 %v1261_v32, %v1253_v27  ;;  %v1330_v35 = vpop.permute.xlu1 %1329 }
0x121c   :  { %v2693_v36 = vadd.f32 %v1330_v35, %v1322_v33 }
0x121d   :  { %2277 = vtanh.f32 %v2691_v34 }
0x121e   :  { %2279 = vtanh.f32 %v2693_v36  ;;  %v1507_v16 = vrot.slane %v2693_v36, 6 }
0x122a   :  { %v2278_v37 = vpop.eup %2277 }
0x122b   :  { %v2280_v38 = vpop.eup %2279  ;;  %1266 = vrot.lane.b32.xlu0 %v2278_v37, %s2327_s25 }
0x122c   :  { %1335 = vrot.lane.b32.xlu1 %v2280_v38, %s2327_s25 }
0x129d   :  { %v1267_v39 = vpop.permute.xlu0 %1266 }
0x129e   :  { %v1269_v40 = vmul.f32 %v1267_v39, %v1251_v20  ;;  %v1336_v42 = vpop.permute.xlu1 %1335 }
0x129f   :  { %v1338_v43 = vmul.f32 %v1336_v42, %v1317_v22 }
0x12a0   :  { %v1339_v44 = vpack.c.bf16 %v1269_v40, %v1269_v40  ;;  %v2301_v40 = vld [vmem:[%s2813_s6] ss:$0 sm:$0xff] }
0x12a1   :  { %v1386_v45 = vpack.c.bf16 %v1338_v43, %v1338_v43 }
0x12a2   :  { %1341 = vrot.lane.b32.xlu0 %v1339_v44, %s2328_s3 }
0x12a3   :  { %v1388_v46 = vrot.slane %v1386_v45, 2 }
0x12a5   :  { %1389 = vrot.lane.b32.xlu1 %v1388_v46, %s2328_s3 }
0x1314   :  { %v1342_v47 = vpop.permute.xlu0 %1341 }
0x1315   :  { %2124 = vmatmul.mubr.msk.bf16.vlgmr.msra.gmra.mxu0 %vm132_vm2, %v1342_v47 }
0x1316   :  { %2136 = vmatpush3.bf16.msra.mxu0 %v2299_v48  ;;  %2139 = vmatprep.mubr.msk.bf16.mxu0 %vm2325_vm0, %v2324_v1 }
0x1317   :  { %v1390_v12 = vpop.permute.xlu1 %1389  ;;  %2137 = vmatprep.subr.bf16.mxu0 %v2324_v1 }
0x1318   :  { %2132 = vmatmul.mubr.msk.bf16.vlgmr.msra.gmra.mxu1 %vm132_vm2, %v1390_v12 }
0x1319   :  { %2144 = vmatpush3.bf16.msra.mxu1 %v2437_v28  ;;  %2147 = vmatprep.mubr.msk.bf16.mxu1 %vm2325_vm0, %v2324_v1 }
0x131a   :  { %2138 = vmatpush3.bf16.msra.mxu0 %v2300_v49  ;;  %2145 = vmatprep.subr.bf16.mxu1 %v2324_v1 }
0x131b   :  { %2151 = vmatprep.subr.bf16.mxu0 %v2324_v1 }
0x131d   :  { %2140 = vmatmul.mubr.msk.bf16.vlgmr.msra.gmra.mxu0 %vm132_vm2, %v1390_v12  ;;  %2146 = vmatpush3.bf16.msra.mxu1 %v2448_v30 }
0x131e   :  { %2152 = vmatpush3.bf16.msra.mxu0 %v2442_v29  ;;  %2155 = vmatprep.mubr.msk.bf16.mxu0 %vm2325_vm0, %v2324_v1 }
0x131f   :  { %2153 = vmatprep.subr.bf16.mxu0 %v2324_v1  ;;  %2159 = vmatprep.subr.mxu1 %v2324_v1 }
0x1322   :  { %2154 = vmatpush3.bf16.msra.mxu0 %v2454_v31 }
0x1323   :  { %2170 = vmatprep.subr.mxu0 %v2324_v1 }
0x13d5   :  { %v1380_v28 = vpop.f32.mrf.mxu0 }
0x13d7   :  { %v2125_v50 = vpop.f32.mrf.mxu0 }
0x13d8   :  { %v1428_v51 = vpop.f32.mrf.mxu1 }
0x13d9   :  { %v1383_v52 = vpop.f32.mrf.mxu0  ;;  %v1429_v53 = vadd.f32 %v2487_v41, %v1428_v51 }
0x13da   :  { %v2133_v30 = vpop.f32.mrf.mxu1 }
0x13db   :  { %v1434_v54 = vadd.f32 %v1429_v53, %v1380_v28  ;;  %v2126_v29 = vpop.f32.mrf.mxu0 }
0x13dc   :  { %v1431_v55 = vpop.f32.mrf.mxu1  ;;  %v1646_v29 = vld [vmem:[%s2814_s7 + $0x10] sm:$0xff] }
0x13dd   :  { %2281 = vtanh.f32 %v1434_v54  ;;  %v1491_v56 = vpop.f32.mrf.mxu0  ;;  %v1435_v41 = vmul.f32 0.5, %v1434_v54  ;;  %v1647_v54 = vld [vmem:[%s2814_s7 + $0x18] sm:$0xff]  ;;  %v1645_v55 = vld [vmem:[%s2814_s7 + $0x8] sm:$0xff] }
0x13de   :  { %v1498_v3 = vrot.slane %v1491_v56, 2  ;;  %v2134_v4 = vpop.f32.mrf.mxu1  ;;  %v1644_v56 = vld [vmem:[%s2814_s7] sm:$0xff] }
0x13df   :  { %v2141_v57 = vpop.f32.mrf.mxu0  ;;  %v1738_v4 = vld [vmem:[%s2816_s9 + $0x38] sm:$0xff] }
0x13e0   :  { %v1500_v58 = vadd.f32 %v1498_v3, %v2424_v10  ;;  %v1737_v57 = vld [vmem:[%s2816_s9 + $0x30] sm:$0xff] }
0x13e1   :  { %v1494_v31 = vpop.f32.mrf.mxu0 }
0x13e2   :  { %2283 = vtanh.f32 %v1500_v58  ;;  %v1501_v62 = vmul.f32 0.5, %v1500_v58  ;;  %v1736_v58 = vld [vmem:[%s2816_s9 + $0x28] sm:$0xff]  ;;  %v1735_v31 = vld [vmem:[%s2816_s9 + $0x20] sm:$0xff] }
0x13e3   :  { %v2142_v59 = vpop.f32.mrf.mxu0  ;;  %2285 = vtanh.f32 %v1435_v41 }
0x13e4   :  { %2287 = vtanh.f32 %v1501_v62  ;;  %v1734_v59 = vld [vmem:[%s2816_s9 + $0x18] sm:$0xff]  ;;  %v1733_v62 = vld [vmem:[%s2816_s9 + $0x10] sm:$0xff] }
0x13ea   :  { %v2282_v60 = vpop.eup %2281 }
0x13eb   :  { %1442 = vrot.lane.b32.xlu1 %v2282_v60, %s2327_s25 }
0x13ef   :  { %v2284_v61 = vpop.eup %2283 }
0x13f0   :  { %1511 = vrot.lane.b32.xlu0 %v2284_v61, %s2327_s25  ;;  %v2286_v63 = vpop.eup %2285 }
0x13f1   :  { %v1437_v2 = vadd.f32 1.0, %v2286_v63  ;;  %v2288_v5 = vpop.eup %2287  ;;  %v1732_v63 = vld [vmem:[%s2816_s9 + $0x8] sm:$0xff] }
0x13f2   :  { %v1503_v7 = vadd.f32 1.0, %v2288_v5  ;;  %v1869_v5 = vld [vmem:[%s2815_s8] ss:$0 sm:$0xff] }
0x13f3   :  { %v1438_v0 = vmul.f32 0.5, %v1437_v2  ;;  %v1731_v2 = vld [vmem:[%s2816_s9] sm:$0xff]  ;;  %s2302_s9 = scalar_lea.vmem %s1829_s21, 32 }
0x13f4   :  { %v1504_v8 = vmul.f32 0.5, %v1503_v7  ;;  %p2303_p0 = scmp.ne.s32.totalorder %s1829_s21, %s2302_s9  ;;  %p2308_p2 = scmp.lt.s32.totalorder %s2302_s9, %s2302_s9 }
0x13f5   :  { %v1440_v13 = vmul.f32 %v1438_v0, %v2691_v34 }
0x13f6   :  { %v1509_v17 = vmul.f32 %v1507_v16, %v1504_v8  ;;  %p2309_p3 = por %p2308_p2, %p2307_p1 }
0x13f8   :  { %p2310_p4 = pnand %p2309_p3, %p2303_p0 }
0x145d   :  { %v1443_v6 = vpop.permute.xlu1 %1442 }
0x145e   :  { %v1445_v10 = vmul.f32 %v1443_v6, %v1438_v0 }
0x1460   :  { %1447 = vrot.lane.b32.xlu1 %v1445_v10, %s2328_s3 }
0x1462   :  { %v1512_v9 = vpop.permute.xlu0 %1511 }
0x1463   :  { %v1514_v11 = vmul.f32 %v1512_v9, %v1504_v8 }
0x1465   :  { %1516 = vrot.lane.b32.xlu0 %v1514_v11, %s2328_s3 }
0x14d2   :  { %v1448_v14 = vpop.permute.xlu1 %1447 }
0x14d3   :  { %v1450_v15 = vadd.f32 %v1448_v14, %v1440_v13 }
0x14d5   :  { %2289 = vtanh.f32 %v1450_v15 }
0x14d7   :  { %v1517_v18 = vpop.permute.xlu0 %1516 }
0x14d8   :  { %v1519_v19 = vadd.f32 %v1517_v18, %v1509_v17 }
0x14da   :  { %2291 = vtanh.f32 %v1519_v19 }
0x14e2   :  { %v2290_v20 = vpop.eup %2289 }
0x14e3   :  { %1453 = vrot.lane.b32.xlu1 %v2290_v20, %s2327_s25 }
0x14e7   :  { %v2292_v21 = vpop.eup %2291 }
0x14e8   :  { %1522 = vrot.lane.b32.xlu0 %v2292_v21, %s2327_s25 }
0x1555   :  { %v1454_v22 = vpop.permute.xlu1 %1453 }
0x1556   :  { %v1456_v23 = vmul.f32 %v1454_v22, %v1438_v0 }
0x1558   :  { %v1526_v24 = vpack.c.bf16 %v1456_v23, %v1456_v23 }
0x155a   :  { %v1523_v25 = vpop.permute.xlu0 %1522  ;;  %1528 = vrot.lane.b32.xlu1 %v1526_v24, %s2328_s3 }
0x155b   :  { %v1525_v26 = vmul.f32 %v1523_v25, %v1504_v8  ;;  %v1871_v8 = vld [vmem:[%s2817_s10] ss:$0 sm:$0xff] }
0x155d   :  { %v1573_v27 = vpack.c.bf16 %v1525_v26, %v1525_v26 }
0x155f   :  { %v1575_v32 = vrot.slane %v1573_v27, 3 }
0x1561   :  { %1576 = vrot.lane.b32.xlu0 %v1575_v32, %s2328_s3 }
0x15cc   :  { %v1529_v33 = vpop.permute.xlu1 %1528 }
0x15cd   :  { %2148 = vmatmul.mubr.msk.bf16.vlgmr.msra.gmra.mxu1 %vm132_vm2, %v1529_v33 }
0x15ce   :  { %2167 = vmatprep.mubr.msk.f32.mxu1 %vm2325_vm0, %v2324_v1  ;;  %2160 = vmatpush3.msra.mxu1 %v1647_v54 }
0x15cf   :  { %2161 = vmatprep.subr.mxu1 %v2324_v1 }
0x15d0   :  { %2162 = vmatpush3.msra.mxu1 %v1646_v29 }
0x15d1   :  { %2163 = vmatprep.subr.mxu1 %v2324_v1 }
0x15d2   :  { %2164 = vmatpush3.msra.mxu1 %v1645_v55 }
0x15d3   :  { %v1577_v34 = vpop.permute.xlu0 %1576  ;;  %2165 = vmatprep.subr.mxu1 %v2324_v1 }
0x15d4   :  { %2156 = vmatmul.mubr.msk.bf16.vlgmr.msra.gmra.mxu0 %vm132_vm2, %v1577_v34  ;;  %2166 = vmatpush3.msra.mxu1 %v1644_v56 }
0x15d5   :  { %2186 = vmatprep.mubr.msk.f32.mxu0 %vm2325_vm0, %v2324_v1  ;;  %2171 = vmatpush3.msra.mxu0 %v1738_v4 }
0x15d6   :  { %2172 = vmatprep.subr.mxu0 %v2324_v1 }
0x15d7   :  { %2173 = vmatpush3.msra.mxu0 %v1737_v57 }
0x15d8   :  { %2174 = vmatprep.subr.mxu0 %v2324_v1 }
0x15d9   :  { %2175 = vmatpush3.msra.mxu0 %v1736_v58 }
0x15da   :  { %2176 = vmatprep.subr.mxu0 %v2324_v1 }
0x15db   :  { %2177 = vmatpush3.msra.mxu0 %v1735_v31 }
0x15dc   :  { %2178 = vmatprep.subr.mxu0 %v2324_v1 }
0x15dd   :  { %2179 = vmatpush3.msra.mxu0 %v1734_v59 }
0x15de   :  { %2180 = vmatprep.subr.mxu0 %v2324_v1 }
0x15df   :  { %2181 = vmatpush3.msra.mxu0 %v1733_v62 }
0x15e0   :  { %2182 = vmatprep.subr.mxu0 %v2324_v1 }
0x15e1   :  { %2183 = vmatpush3.msra.mxu0 %v1732_v63 }
0x15e2   :  { %2184 = vmatprep.subr.mxu0 %v2324_v1 }
0x15e3   :  { %2185 = vmatpush3.msra.mxu0 %v1731_v2 }
0x168d   :  { %v1567_v35 = vpop.f32.mrf.mxu1 }
0x168f   :  { %v2149_v36 = vpop.f32.mrf.mxu1 }
0x1691   :  { %v1570_v37 = vpop.f32.mrf.mxu1 }
0x1693   :  { %v2150_v38 = vpop.f32.mrf.mxu1 }
0x1694   :  { %v1615_v39 = vpop.f32.mrf.mxu0 }
0x1695   :  { %v1616_v42 = vadd.f32 %v2301_v40, %v1615_v39 }
0x1696   :  { %v2157_v43 = vpop.f32.mrf.mxu0 }
0x1697   :  { %v1621_v44 = vadd.f32 %v1616_v42, %v1567_v35 }
0x1698   :  { %v1618_v45 = vpop.f32.mrf.mxu0 }
0x1699   :  { %2293 = vtanh.f32 %v1621_v44  ;;  %v1622_v48 = vmul.f32 0.5, %v1621_v44 }
0x169a   :  { %v2158_v46 = vpop.f32.mrf.mxu0 }
0x169b   :  { %2295 = vtanh.f32 %v1622_v48 }
0x16a6   :  { %v2294_v47 = vpop.eup %2293 }
0x16a7   :  { %1629 = vrot.lane.b32.xlu0 %v2294_v47, %s2327_s25 }
0x16a8   :  { %v2296_v12 = vpop.eup %2295 }
0x16a9   :  { %v1624_v49 = vadd.f32 1.0, %v2296_v12 }
0x16ab   :  { %v1625_v28 = vmul.f32 0.5, %v1624_v49 }
0x16ad   :  { %v1627_v52 = vmul.f32 %v1625_v28, %v1450_v15 }
0x1719   :  { %v1630_v50 = vpop.permute.xlu0 %1629 }
0x171a   :  { %v1632_v51 = vmul.f32 %v1630_v50, %v1625_v28 }
0x171c   :  { %1634 = vrot.lane.b32.xlu1 %v1632_v51, %s2328_s3 }
0x178e   :  { %v1635_v53 = vpop.permute.xlu1 %1634 }
0x178f   :  { %v1637_v30 = vadd.f32 %v1635_v53, %v1627_v52 }
0x1791   :  { %2297 = vtanh.f32 %v1637_v30 }
0x179e   :  { %v2298_v3 = vpop.eup %2297 }
0x179f   :  { %1640 = vrot.lane.b32.xlu0 %v2298_v3, %s2327_s25 }
0x1811   :  { %v1641_v60 = vpop.permute.xlu0 %1640 }
0x1812   :  { %v1643_v61 = vmul.f32 %v1641_v60, %v1625_v28 }
0x1814   :  { %1656 = vrot.lane.b32.xlu1 %v1643_v61, %s2328_s3 }
0x1886   :  { %v1657_v41 = vpop.permute.xlu1 %1656 }
0x1887   :  { %2168 = vmatmul.mubr.msk.f32.vlgmr.msra.gmra.mxu1 %vm132_vm2, %v1657_v41 }
0x1947   :  { %v1726_v0 = vpop.f32.mrf.mxu1 }
0x1948   :  { %v1727_v6 = vadd.f32 %v1869_v5, %v1726_v0 }
0x1949   :  { %v2169_v7 = vpop.f32.mrf.mxu1 }
0x194a   :  { %v1730_v10 = vmax.f32 %v1727_v6, 0.0 }
0x194c   :  { %2187 = vmatmul.mubr.msk.f32.vlgmr.msra.gmra.mxu0 %vm1746_vm3, %v1730_v10 }
0x1a0c   :  { %v1816_v1 = vpop.f32.mrf.mxu0 }
0x1a0d   :  { %v1817_v9 = vadd.f32 %v1871_v8, %v1816_v1 }
0x1a0e   :  { %v2188_v11 = vpop.f32.mrf.mxu0 }
0x1a0f   :  { %1821 = vst.msk [vmem:[#allocation2] sm:$0x3] %vm1820_vm4, %v1817_v9 }
0x1a10   :  { %2313 = shalt.err (!%p2310_p4)
}
0x1a11   :  { %1831 = dma.vmem_to_hbm [thread:$0]  %s1829_s21, 32, %s2818_s11, [#allocation3]  }
0x1a12   :  { %2322 = dma.done.wait [#allocation3], 32  }
0x1a13   :  { %2323 = vsyncadd [#allocation3], 4294967264 }
0x1a14   :  { %1835 = vsyncpa [#allocation3], 1 }

</bundles_post_ra>
